<compile_context>
chip_gen: v7x
topology: tpu7x:2x2x1
jax: 0.10.0
libtpu: 0.0.40
codegen_flags: <defaults>
</compile_context>

<pallas_src>
import functools

import jax
import jax.numpy as jnp
from jax.experimental import pallas as pl
from jax.experimental.pallas import tpu as pltpu


_VMEM_LIMIT = 48 * 1024 * 1024      # leave headroom on v7x (64 MiB physical)
_VMEM_BUDGET = 24 * 1024 * 1024     # target per-kernel working set for tiling
_MASK_VALUE = float(jnp.finfo(jnp.float32).min)   # torch masked_fill(finfo.min)


def _pick_tile(n, candidates):
    """Largest candidate that evenly divides n, else the full extent.
    TODO(synk): non-divisible large extents fall back to one full-size tile; a
    cdiv grid + masked tail tile would keep steady 128/256-aligned tiles."""
    for c in candidates:
        if c <= n and n % c == 0:
            return c
    return n


def _pick_group_block(g, bytes_per_group, fixed_bytes=0, budget=_VMEM_BUDGET):
    """Largest divisor of g whose estimated VMEM working set stays in budget."""
    for cand in range(g, 0, -1):
        if g % cand == 0 and fixed_bytes + cand * bytes_per_group <= budget:
            return cand
    return 1


# ---------------------------------------------------------------------------
# Head projection kernel: y[b, g, s, :] = x[b, s, :] @ w[g]
#   x: (B, S, K) bf16, w: (G, K, D) bf16 (per-head pre-transposed nn.Linear
#   weights, scale already folded in for q) -> (B, G, S, D) bf16.
# ---------------------------------------------------------------------------
def _head_proj_kernel(x_ref, w_ref, o_ref, acc_ref, *, gblk):
    kk = pl.program_id(3)

    @pl.when(kk == 0)
    def _():
        acc_ref[...] = jnp.zeros_like(acc_ref)

    x = x_ref[0]                                     # (tm, tk) bf16
    for g in range(gblk):                            # static unroll over heads
        acc_ref[g] += jnp.dot(x, w_ref[g], preferred_element_type=jnp.float32)

    @pl.when(kk == pl.num_programs(3) - 1)
    def _():
        o_ref[0] = acc_ref[...].astype(o_ref.dtype)


def head_projection(x, w):
    B, S, K = x.shape
    G, _, D = w.shape
    # Small-S: one seq tile so each weight block streams once per batch row.
    tm = S if S <= 1024 else _pick_tile(S, (1024, 512, 256, 128))
    tk = _pick_tile(K, (1024, 512, 256))
    per_group = (2 * tk * D * 2        # w blocks (double-buffered, bf16)
                 + 2 * tm * D * 2      # out blocks
                 + tm * D * 4)         # f32 accumulator
    gblk = _pick_group_block(G, per_group, fixed_bytes=2 * tm * tk * 2)
    return pl.pallas_call(
        functools.partial(_head_proj_kernel, gblk=gblk),
        out_shape=jax.ShapeDtypeStruct((B, G, S, D), jnp.bfloat16),
        grid=(G // gblk, B, S // tm, K // tk),
        in_specs=[
            pl.BlockSpec((1, tm, tk), lambda g, b, i, k: (b, i, k)),
            pl.BlockSpec((gblk, tk, D), lambda g, b, i, k: (g, k, 0)),
        ],
        out_specs=pl.BlockSpec((1, gblk, tm, D), lambda g, b, i, k: (b, g, i, 0)),
        scratch_shapes=[pltpu.VMEM((gblk, tm, D), jnp.float32)],
        compiler_params=pltpu.CompilerParams(
            dimension_semantics=("parallel", "parallel", "parallel", "arbitrary"),
            vmem_limit_bytes=_VMEM_LIMIT,
        ),
    )(x, w)


# ---------------------------------------------------------------------------
# Flash-style attention kernel (online softmax, hblk heads per grid step)
# ---------------------------------------------------------------------------
def _flash_kernel(*refs, mask_mode):
    if mask_mode is None:
        q_ref, k_ref, v_ref, o_ref, m_sc, l_sc, acc_sc = refs
        mask_ref = None
    else:
        q_ref, k_ref, v_ref, mask_ref, o_ref, m_sc, l_sc, acc_sc = refs
    kv = pl.program_id(3)

    @pl.when(kv == 0)
    def _():
        m_sc[...] = jnp.full_like(m_sc, -jnp.inf)
        l_sc[...] = jnp.zeros_like(l_sc)
        acc_sc[...] = jnp.zeros_like(acc_sc)

    # (hblk, tq, D) x (hblk, tk, D) -> (hblk, tq, tk), f32 accumulation.
    # TODO(synk): a D-major K layout would avoid the minor-dim contraction
    # relayout on v6e/v7x (2 XLUs); left as-is for simplicity.
    s = jnp.einsum("hqd,hkd->hqk", q_ref[0], k_ref[0],
                   preferred_element_type=jnp.float32)
    if mask_mode == "bool":
        # Matches torch masked_fill(mask, finfo(f32).min); stays finite so the
        # online softmax never sees exp(-inf - (-inf)).
        s = jnp.where(mask_ref[0][None, :, :] != 0, _MASK_VALUE, s)
    elif mask_mode == "add":
        # TODO(synk): additive masks containing literal -inf on a fully masked
        # row would NaN (the torch reference behaves the same way).
        s = s + mask_ref[0][None, :, :].astype(jnp.float32)

    m_prev = m_sc[...]
    m_new = jnp.maximum(m_prev, jnp.max(s, axis=-1, keepdims=True))
    alpha = jnp.exp(m_prev - m_new)
    p = jnp.exp(s - m_new)
    l_sc[...] = alpha * l_sc[...] + jnp.sum(p, axis=-1, keepdims=True)
    # probabilities in bf16 (matches the module), PV accumulated in f32
    acc_sc[...] = alpha * acc_sc[...] + jnp.einsum(
        "hqk,hkd->hqd", p.astype(jnp.bfloat16), v_ref[0],
        preferred_element_type=jnp.float32)
    m_sc[...] = m_new

    @pl.when(kv == pl.num_programs(3) - 1)
    def _():
        o_ref[0] = (acc_sc[...] *
                    pl.reciprocal(l_sc[...], approx=True)).astype(o_ref.dtype)


def flash_attention(q_arr, kv_arr, mask, mask_mode, *, H, q_base, k_base, v_base):
    """q_arr: (B, Gq, Sq, D) bf16, kv_arr: (B, Gk, Skv, D) bf16 (head-major
    projection outputs).  q/k/v of the H attended heads live at group offsets
    q_base/k_base/v_base.  mask: None, (Bm, Sq, Skv) int8 ("bool") or bf16
    ("add").  Returns (B, H, Sq, D) bf16."""
    B, _, Sq, D = q_arr.shape
    Skv = kv_arr.shape[2]
    tq = _pick_tile(Sq, (256, 128))
    tk = _pick_tile(Skv, (512, 256, 128))
    per_head = (2 * tq * D * 2            # q blocks
                + 2 * (2 * tk * D * 2)    # k + v blocks
                + 2 * tq * D * 2          # out blocks
                + tq * D * 4 + tq * 8     # acc + m + l scratch
                + tq * tk * 4)            # live f32 logits
    fixed = 2 * tq * tk if mask is not None else 0
    hblk = _pick_group_block(H, per_head, fixed_bytes=fixed)
    nq, nk = Sq // tq, Skv // tk
    assert q_base % hblk == 0 and k_base % hblk == 0 and v_base % hblk == 0
    qb, kb, vb = q_base // hblk, k_base // hblk, v_base // hblk

    in_specs = [
        pl.BlockSpec((1, hblk, tq, D), lambda b, h, i, j: (b, qb + h, i, 0)),
        pl.BlockSpec((1, hblk, tk, D), lambda b, h, i, j: (b, kb + h, j, 0)),
        pl.BlockSpec((1, hblk, tk, D), lambda b, h, i, j: (b, vb + h, j, 0)),
    ]
    args = [q_arr, kv_arr, kv_arr]
    if mask is not None:
        if mask.shape[0] == B:
            in_specs.append(pl.BlockSpec((1, tq, tk), lambda b, h, i, j: (b, i, j)))
        else:  # one mask shared across the batch
            in_specs.append(pl.BlockSpec((1, tq, tk), lambda b, h, i, j: (0, i, j)))
        args.append(mask)

    return pl.pallas_call(
        functools.partial(_flash_kernel, mask_mode=mask_mode),
        out_shape=jax.ShapeDtypeStruct((B, H, Sq, D), jnp.bfloat16),
        grid=(B, H // hblk, nq, nk),
        in_specs=in_specs,
        out_specs=pl.BlockSpec((1, hblk, tq, D), lambda b, h, i, j: (b, h, i, 0)),
        scratch_shapes=[
            pltpu.VMEM((hblk, tq, 1), jnp.float32),    # running max
            pltpu.VMEM((hblk, tq, 1), jnp.float32),    # running denominator
            pltpu.VMEM((hblk, tq, D), jnp.float32),    # output accumulator
        ],
        compiler_params=pltpu.CompilerParams(
            dimension_semantics=("parallel", "parallel", "parallel", "arbitrary"),
            vmem_limit_bytes=_VMEM_LIMIT,
        ),
    )(*args)


# ---------------------------------------------------------------------------
# o_proj kernel: head axis = reduction grid axis, hblk heads per step, bf16
# operands, optional in-place accumulation into a previous partial result.
# ---------------------------------------------------------------------------
def _oproj_kernel(*refs, hblk, has_init):
    if has_init:
        x_ref, w_ref, init_ref, o_ref, acc_ref = refs
    else:
        x_ref, w_ref, o_ref, acc_ref = refs
        init_ref = None
    h = pl.program_id(3)

    @pl.when(h == 0)
    def _():
        if has_init:
            acc_ref[...] = init_ref[0]
        else:
            acc_ref[...] = jnp.zeros_like(acc_ref)

    x = x_ref[0]                                     # (hblk, tm, D) bf16
    acc = acc_ref[...]
    for hh in range(hblk):                           # static unroll over heads
        acc += jnp.dot(x[hh], w_ref[hh], preferred_element_type=jnp.float32)
    acc_ref[...] = acc

    @pl.when(h == pl.num_programs(3) - 1)
    def _():
        o_ref[0] = acc_ref[...]


def oproj_heads(attn, wo_heads, init=None):
    """attn: (B, H, Sq, D) bf16, wo_heads: (H, D, N) bf16, init: (B, Sq, N) f32
    or None.  Returns (B, Sq, N) f32 = init + sum_h attn[:, h] @ wo_heads[h]."""
    B, H, Sq, D = attn.shape
    N = wo_heads.shape[2]
    tm = Sq if Sq <= 1024 else _pick_tile(Sq, (1024, 512, 256, 128))
    tn = _pick_tile(N, (512, 256, 128))
    per_head = 2 * tm * D * 2 + 2 * D * tn * 2
    fixed = (3 + (2 if init is not None else 0)) * tm * tn * 4
    hblk = _pick_group_block(H, per_head, fixed_bytes=fixed)

    in_specs = [
        pl.BlockSpec((1, hblk, tm, D), lambda b, i, j, h: (b, h, i, 0)),
        pl.BlockSpec((hblk, D, tn), lambda b, i, j, h: (h, 0, j)),
    ]
    args = [attn, wo_heads]
    io_aliases = {}
    if init is not None:
        in_specs.append(pl.BlockSpec((1, tm, tn), lambda b, i, j, h: (b, i, j)))
        args.append(init)
        io_aliases = {2: 0}   # accumulate in place: init buffer becomes the output

    return pl.pallas_call(
        functools.partial(_oproj_kernel, hblk=hblk, has_init=init is not None),
        out_shape=jax.ShapeDtypeStruct((B, Sq, N), jnp.float32),
        grid=(B, Sq // tm, N // tn, H // hblk),
        in_specs=in_specs,
        out_specs=pl.BlockSpec((1, tm, tn), lambda b, i, j, h: (b, i, j)),
        scratch_shapes=[pltpu.VMEM((tm, tn), jnp.float32)],
        input_output_aliases=io_aliases,
        compiler_params=pltpu.CompilerParams(
            dimension_semantics=("parallel", "parallel", "parallel", "arbitrary"),
            vmem_limit_bytes=_VMEM_LIMIT,
        ),
    )(*args)


# ---------------------------------------------------------------------------
# Parameter preparation (one-time, outside the forward path)
# ---------------------------------------------------------------------------
def prepare_params(params, *, n_self, n_total, mirror=False):
    hidden = params["wq"].shape[0]
    D = hidden // n_total
    n_cross = n_total - n_self
    scale = jnp.float32(D ** (-0.5))
    sl_self = slice(n_total - n_self, n_total) if mirror else slice(0, n_self)
    sl_cross = slice(0, n_cross) if mirror else slice(n_self, n_total)

    def per_head_t(w):  # nn.Linear weight (H*D, K) -> (H, K, D): y_h = x @ w_h
        return w.reshape(n_total, D, hidden).transpose(0, 2, 1)

    wq_h = per_head_t(params["wq"]) * scale          # softmax scale folded in
    wk_h = per_head_t(params["wk"])
    wv_h = per_head_t(params["wv"])
    wo_h = params["wo"].reshape(hidden, n_total, D).transpose(1, 2, 0)  # (H,D,N)

    # TODO(synk): bf16 o_proj weights trade a tiny bit of precision vs. the
    # module's f32 o_proj (accumulation stays f32); validated in the test.
    prep = {}
    if n_self > 0:
        prep["w_self"] = jnp.concatenate(
            [wq_h[sl_self], wk_h[sl_self], wv_h[sl_self]], axis=0
        ).astype(jnp.bfloat16)                       # (3*n_self, K, D)
        prep["wo_self"] = wo_h[sl_self].astype(jnp.bfloat16)
    if n_cross > 0:
        prep["w_crossq"] = wq_h[sl_cross].astype(jnp.bfloat16)   # (n_cross, K, D)
        prep["w_crosskv"] = jnp.concatenate(
            [wk_h[sl_cross], wv_h[sl_cross]], axis=0
        ).astype(jnp.bfloat16)                       # (2*n_cross, K, D)
        prep["wo_cross"] = wo_h[sl_cross].astype(jnp.bfloat16)
    return prep


def _prep_mask(mask, sq, skv):
    """Normalize to (int8 mask, "bool") or (bf16 additive mask, "add") of shape
    (Bm, sq, skv), or (None, None)."""
    if mask is None:
        return None, None
    m = mask
    if m.ndim == 4:
        # TODO(synk): per-head masks (shape[1] > 1) are not supported; one mask
        # is broadcast across all heads like the common case.
        m = m[:, 0]
    if m.ndim == 2:
        m = m[None]
    if m.dtype == jnp.bool_:
        return jnp.broadcast_to(m, (m.shape[0], sq, skv)).astype(jnp.int8), "bool"
    return jnp.broadcast_to(m.astype(jnp.bfloat16), (m.shape[0], sq, skv)), "add"


# ---------------------------------------------------------------------------
# HybridAttention forward (Pallas hot paths + thin glue; no relayout copies)
# ---------------------------------------------------------------------------
def hybrid_attention_forward(prep, x_q, x_kv, mask=None, *, n_self, n_total,
                             mirror=False):
    B, Sq, hidden = x_q.shape
    Skv = x_kv.shape[1]
    n_cross = n_total - n_self

    xq = x_q.astype(jnp.bfloat16)
    xkv = x_kv.astype(jnp.bfloat16)

    out = None
    if n_self > 0:
        proj_s = head_projection(xq, prep["w_self"])       # (B, 3*n_self, Sq, D)
        m, mode = _prep_mask(mask, Sq, Sq)
        attn_s = flash_attention(proj_s, proj_s, m, mode, H=n_self,
                                 q_base=0, k_base=n_self, v_base=2 * n_self)
        out = oproj_heads(attn_s, prep["wo_self"])         # (B, Sq, hidden) f32
    if n_cross > 0:
        proj_cq = head_projection(xq, prep["w_crossq"])    # (B, n_cross, Sq, D)
        proj_ckv = head_projection(xkv, prep["w_crosskv"]) # (B, 2*n_cross, Skv, D)
        m, mode = _prep_mask(mask, Sq, Skv)
        attn_c = flash_attention(proj_cq, proj_ckv, m, mode, H=n_cross,
                                 q_base=0, k_base=0, v_base=n_cross)
        out = oproj_heads(attn_c, prep["wo_cross"], init=out)

    # TODO(synk): dropout with p > 0 would need pltpu.prng_* inside the flash
    # kernel; the module defaults to p = 0.0 (identity).
    return out


# ---------------------------------------------------------------------------
# Pure-JAX reference (mirrors the PyTorch module's casting steps exactly)
# ---------------------------------------------------------------------------
def reference_forward(params, x_q, x_kv, mask=None, *, n_self, n_total,
                      mirror=False):
    B, Sq, hidden = x_q.shape
    head_dim = hidden // n_total
    scale = head_dim ** (-0.5)
    i0 = (n_total - n_self) if mirror else 0
    i1 = i0 + n_self

    def proj(x, w):
        y = x @ w.T
        return y.reshape(B, x.shape[1], n_total, head_dim).transpose(0, 2, 1, 3)

    q, k_q, v_q = proj(x_q, params["wq"]), proj(x_q, params["wk"]), proj(x_q, params["wv"])
    k_kv, v_kv = proj(x_kv, params["wk"]), proj(x_kv, params["wv"])

    def attn(qh, kh, vh):
        w = jnp.einsum("bhqd,bhkd->bhqk", qh.astype(jnp.float32),
                       kh.astype(jnp.float32)) * scale
        if mask is not None:
            if mask.dtype == jnp.bool_:
                w = jnp.where(mask, jnp.finfo(jnp.float32).min, w)
            else:
                w = w + mask.astype(jnp.float32)
        w = jax.nn.softmax(w, axis=-1).astype(jnp.bfloat16)
        return jnp.einsum("bhqk,bhkd->bhqd", w, vh.astype(jnp.bfloat16)).astype(jnp.bfloat16)

    out_self = attn(q[:, i0:i1], k_q[:, i0:i1], v_q[:, i0:i1])
    out_cross = attn(jnp.concatenate([q[:, :i0], q[:, i1:]], axis=1),
                     jnp.concatenate([k_kv[:, :i0], k_kv[:, i1:]], axis=1),
                     jnp.concatenate([v_kv[:, :i0], v_kv[:, i1:]], axis=1))
    out = jnp.concatenate([out_cross[:, :i0], out_self, out_cross[:, i0:]], axis=1)
    out = out.astype(jnp.float32).transpose(0, 2, 1, 3).reshape(B, Sq, hidden)
    return out @ params["wo"].T


# ---------------------------------------------------------------------------
if __name__ == "__main__":
    B, Sq, Skv = 2, 8, 8
    n_total, n_self, head_dim = 4, 2, 8
    hidden = n_total * head_dim  # 32

    key = jax.random.PRNGKey(0)
    kq, kk, kv, ko, kx1, kx2 = jax.random.split(key, 6)
    params = {
        "wq": 0.05 * jax.random.normal(kq, (hidden, hidden), jnp.float32),
        "wk": 0.05 * jax.random.normal(kk, (hidden, hidden), jnp.float32),
        "wv": 0.05 * jax.random.normal(kv, (hidden, hidden), jnp.float32),
        "wo": 0.05 * jax.random.normal(ko, (hidden, hidden), jnp.float32),
    }
    x_q = jax.random.normal(kx1, (B, Sq, hidden), jnp.float32)
    x_kv = jax.random.normal(kx2, (B, Skv, hidden), jnp.float32)

    # ---- no-mask, mirror=False -------------------------------------------
    prep = prepare_params(params, n_self=n_self, n_total=n_total, mirror=False)
    fwd = jax.jit(functools.partial(hybrid_attention_forward,
                                    n_self=n_self, n_total=n_total, mirror=False))
    out = jax.block_until_ready(fwd(prep, x_q, x_kv, None))
    ref = reference_forward(params, x_q, x_kv, None,
                            n_self=n_self, n_total=n_total, mirror=False)
    assert out.shape == (B, Sq, hidden) and out.dtype == jnp.float32
    err = float(jnp.max(jnp.abs(out - ref)))
    assert jnp.allclose(out, ref, atol=1e-2, rtol=5e-2), f"no-mask max abs diff = {err}"

    # ---- bool causal mask, mirror=True (exercises the masked kernel) ------
    mask = jnp.triu(jnp.ones((Sq, Skv), jnp.bool_), k=1)
    prep_m = prepare_params(params, n_self=n_self, n_total=n_total, mirror=True)
    fwd_m = jax.jit(functools.partial(hybrid_attention_forward,
                                      n_self=n_self, n_total=n_total, mirror=True))
    out_m = jax.block_until_ready(fwd_m(prep_m, x_q, x_kv, mask))
    ref_m = reference_forward(params, x_q, x_kv, mask,
                              n_self=n_self, n_total=n_total, mirror=True)
    assert out_m.shape == (B, Sq, hidden) and out_m.dtype == jnp.float32
    err_m = float(jnp.max(jnp.abs(out_m - ref_m)))
    assert jnp.allclose(out_m, ref_m, atol=1e-2, rtol=5e-2), f"masked max abs diff = {err_m}"

    print("KERNEL_OK")
</pallas_src>

<mosaic_0001>
module attributes {stable_mosaic.version = 11 : i64} {
  func.func @_flash_kernel(%arg0: i32, %arg1: i32, %arg2: i32, %arg3: i32, %arg4: memref<1x2x8x8xbf16, #tpu.memory_space<vmem>>, %arg5: memref<1x2x8x8xbf16, #tpu.memory_space<vmem>>, %arg6: memref<1x2x8x8xbf16, #tpu.memory_space<vmem>>, %arg7: memref<1x2x8x8xbf16, #tpu.memory_space<vmem>>, %arg8: memref<2x8x1xf32, #tpu.memory_space<vmem>>, %arg9: memref<2x8x1xf32, #tpu.memory_space<vmem>>, %arg10: memref<2x8x8xf32, #tpu.memory_space<vmem>>) attributes {dimension_semantics = [#tpu.dimension_semantics<parallel>, #tpu.dimension_semantics<parallel>, #tpu.dimension_semantics<parallel>, #tpu.dimension_semantics<arbitrary>], iteration_bounds = array<i64: 2, 1, 1, 1>, scalar_prefetch = 0 : i64, scratch_operands = 3 : i64, tpu.core_type = #tpu.core_type<tc>, window_params = [{transform_indices = @transform_0, window_bounds = array<i64: 1, 2, 8, 8>}, {transform_indices = @transform_1, window_bounds = array<i64: 1, 2, 8, 8>}, {transform_indices = @transform_2, window_bounds = array<i64: 1, 2, 8, 8>}, {transform_indices = @transform_3, window_bounds = array<i64: 1, 2, 8, 8>}]} {
    %c0_i32 = arith.constant 0 : i32
    %0 = arith.cmpi eq, %arg3, %c0_i32 : i32
    %1 = arith.extui %0 : i1 to i32
    %c0_i32_0 = arith.constant 0 : i32
    %2 = arith.cmpi ne, %1, %c0_i32_0 : i32
    scf.if %2 {
      %cst_35 = arith.constant 0xFF800000 : f32
      %36 = vector.broadcast %cst_35 : f32 to vector<2x8x1xf32>
      %c0_36 = arith.constant 0 : index
      %c0_37 = arith.constant 0 : index
      %c0_38 = arith.constant 0 : index
      %37 = vector.load %arg8[%c0_36, %c0_37, %c0_38] : memref<2x8x1xf32, #tpu.memory_space<vmem>>, vector<2x8x1xf32>
      tpu.vector_store %arg8[%c0_36, %c0_37, %c0_38], %36 {strides = array<i32>} : memref<2x8x1xf32, #tpu.memory_space<vmem>>, vector<2x8x1xf32>,
      %cst_39 = arith.constant 0.000000e+00 : f32
      %38 = vector.broadcast %cst_39 : f32 to vector<2x8x1xf32>
      %c0_40 = arith.constant 0 : index
      %c0_41 = arith.constant 0 : index
      %c0_42 = arith.constant 0 : index
      %39 = vector.load %arg9[%c0_40, %c0_41, %c0_42] : memref<2x8x1xf32, #tpu.memory_space<vmem>>, vector<2x8x1xf32>
      tpu.vector_store %arg9[%c0_40, %c0_41, %c0_42], %38 {strides = array<i32>} : memref<2x8x1xf32, #tpu.memory_space<vmem>>, vector<2x8x1xf32>,
      %cst_43 = arith.constant 0.000000e+00 : f32
      %40 = vector.broadcast %cst_43 : f32 to vector<2x8x8xf32>
      %c0_44 = arith.constant 0 : index
      %c0_45 = arith.constant 0 : index
      %c0_46 = arith.constant 0 : index
      %41 = vector.load %arg10[%c0_44, %c0_45, %c0_46] : memref<2x8x8xf32, #tpu.memory_space<vmem>>, vector<2x8x8xf32>
      tpu.vector_store %arg10[%c0_44, %c0_45, %c0_46], %40 {strides = array<i32>} : memref<2x8x8xf32, #tpu.memory_space<vmem>>, vector<2x8x8xf32>,
    } else {
    }
    %c0 = arith.constant 0 : index
    %c0_1 = arith.constant 0 : index
    %c0_2 = arith.constant 0 : index
    %c0_3 = arith.constant 0 : index
    %3 = vector.load %arg4[%c0, %c0_1, %c0_2, %c0_3] : memref<1x2x8x8xbf16, #tpu.memory_space<vmem>>, vector<1x2x8x8xbf16>
    %4 = vector.shape_cast %3 : vector<1x2x8x8xbf16> to vector<2x8x8xbf16>
    %c0_4 = arith.constant 0 : index
    %c0_5 = arith.constant 0 : index
    %c0_6 = arith.constant 0 : index
    %c0_7 = arith.constant 0 : index
    %5 = vector.load %arg5[%c0_4, %c0_5, %c0_6, %c0_7] : memref<1x2x8x8xbf16, #tpu.memory_space<vmem>>, vector<1x2x8x8xbf16>
    %6 = vector.shape_cast %5 : vector<1x2x8x8xbf16> to vector<2x8x8xbf16>
    "tpu.trace_start"() <{level = 10 : i32, message = "hqd,hkd->hqk"}> : () -> ()
    %cst = arith.constant dense<0.000000e+00> : vector<2x8x8xf32>
    %7 = tpu.matmul %4, %6, %cst {dimension_numbers = #tpu.dot_dimension_numbers<[2], [2], [1], [1], [0, 0, 0, 1, 1, 1], [0], [0]>} : vector<2x8x8xbf16>, vector<2x8x8xbf16>, vector<2x8x8xf32> -> vector<2x8x8xf32>
    "tpu.trace_stop"() : () -> ()
    %c0_8 = arith.constant 0 : index
    %c0_9 = arith.constant 0 : index
    %c0_10 = arith.constant 0 : index
    %8 = vector.load %arg8[%c0_8, %c0_9, %c0_10] : memref<2x8x1xf32, #tpu.memory_space<vmem>>, vector<2x8x1xf32>
    %cst_11 = arith.constant dense<0xFF800000> : vector<2x8xf32>
    %9 = vector.multi_reduction <maximumf>, %7, %cst_11 [2] : vector<2x8x8xf32> to vector<2x8xf32>
    %10 = vector.shape_cast %9 : vector<2x8xf32> to vector<2x8x1xf32>
    %11 = arith.maximumf %8, %10 : vector<2x8x1xf32>
    %12 = arith.subf %8, %11 : vector<2x8x1xf32>
    %13 = math.exp %12 : vector<2x8x1xf32>
    %14 = vector.broadcast %11 : vector<2x8x1xf32> to vector<2x8x8xf32>
    %15 = arith.subf %7, %14 : vector<2x8x8xf32>
    %16 = math.exp %15 : vector<2x8x8xf32>
    %c0_12 = arith.constant 0 : index
    %c0_13 = arith.constant 0 : index
    %c0_14 = arith.constant 0 : index
    %17 = vector.load %arg9[%c0_12, %c0_13, %c0_14] : memref<2x8x1xf32, #tpu.memory_space<vmem>>, vector<2x8x1xf32>
    %18 = arith.mulf %13, %17 : vector<2x8x1xf32>
    %cst_15 = arith.constant dense<0.000000e+00> : vector<2x8xf32>
    %19 = vector.multi_reduction <add>, %16, %cst_15 [2] : vector<2x8x8xf32> to vector<2x8xf32>
    %20 = vector.shape_cast %19 : vector<2x8xf32> to vector<2x8x1xf32>
    %21 = arith.addf %18, %20 : vector<2x8x1xf32>
    %c0_16 = arith.constant 0 : index
    %c0_17 = arith.constant 0 : index
    %c0_18 = arith.constant 0 : index
    %22 = vector.load %arg9[%c0_16, %c0_17, %c0_18] : memref<2x8x1xf32, #tpu.memory_space<vmem>>, vector<2x8x1xf32>
    tpu.vector_store %arg9[%c0_16, %c0_17, %c0_18], %21 {strides = array<i32>} : memref<2x8x1xf32, #tpu.memory_space<vmem>>, vector<2x8x1xf32>,
    %c0_19 = arith.constant 0 : index
    %c0_20 = arith.constant 0 : index
    %c0_21 = arith.constant 0 : index
    %23 = vector.load %arg10[%c0_19, %c0_20, %c0_21] : memref<2x8x8xf32, #tpu.memory_space<vmem>>, vector<2x8x8xf32>
    %24 = vector.broadcast %13 : vector<2x8x1xf32> to vector<2x8x8xf32>
    %25 = arith.mulf %24, %23 : vector<2x8x8xf32>
    %26 = arith.truncf %16 : vector<2x8x8xf32> to vector<2x8x8xbf16>
    %c0_22 = arith.constant 0 : index
    %c0_23 = arith.constant 0 : index
    %c0_24 = arith.constant 0 : index
    %c0_25 = arith.constant 0 : index
    %27 = vector.load %arg6[%c0_22, %c0_23, %c0_24, %c0_25] : memref<1x2x8x8xbf16, #tpu.memory_space<vmem>>, vector<1x2x8x8xbf16>
    %28 = vector.shape_cast %27 : vector<1x2x8x8xbf16> to vector<2x8x8xbf16>
    "tpu.trace_start"() <{level = 10 : i32, message = "hqk,hkd->hqd"}> : () -> ()
    %cst_26 = arith.constant dense<0.000000e+00> : vector<2x8x8xf32>
    %29 = tpu.matmul %26, %28, %cst_26 {dimension_numbers = #tpu.dot_dimension_numbers<[2], [1], [1], [2], [0, 0, 0, 1, 1, 2], [0], [0]>} : vector<2x8x8xbf16>, vector<2x8x8xbf16>, vector<2x8x8xf32> -> vector<2x8x8xf32>
    "tpu.trace_stop"() : () -> ()
    %30 = arith.addf %25, %29 : vector<2x8x8xf32>
    %c0_27 = arith.constant 0 : index
    %c0_28 = arith.constant 0 : index
    %c0_29 = arith.constant 0 : index
    %31 = vector.load %arg10[%c0_27, %c0_28, %c0_29] : memref<2x8x8xf32, #tpu.memory_space<vmem>>, vector<2x8x8xf32>
    tpu.vector_store %arg10[%c0_27, %c0_28, %c0_29], %30 {strides = array<i32>} : memref<2x8x8xf32, #tpu.memory_space<vmem>>, vector<2x8x8xf32>,
    %c0_30 = arith.constant 0 : index
    %c0_31 = arith.constant 0 : index
    %c0_32 = arith.constant 0 : index
    %32 = vector.load %arg8[%c0_30, %c0_31, %c0_32] : memref<2x8x1xf32, #tpu.memory_space<vmem>>, vector<2x8x1xf32>
    tpu.vector_store %arg8[%c0_30, %c0_31, %c0_32], %11 {strides = array<i32>} : memref<2x8x1xf32, #tpu.memory_space<vmem>>, vector<2x8x1xf32>,
    %c0_i32_33 = arith.constant 0 : i32
    %33 = arith.cmpi eq, %arg3, %c0_i32_33 : i32
    %34 = arith.extui %33 : i1 to i32
    %c0_i32_34 = arith.constant 0 : i32
    %35 = arith.cmpi ne, %34, %c0_i32_34 : i32
    scf.if %35 {
      %c0_35 = arith.constant 0 : index
      %c0_36 = arith.constant 0 : index
      %c0_37 = arith.constant 0 : index
      %36 = vector.load %arg10[%c0_35, %c0_36, %c0_37] : memref<2x8x8xf32, #tpu.memory_space<vmem>>, vector<2x8x8xf32>
      %c0_38 = arith.constant 0 : index
      %c0_39 = arith.constant 0 : index
      %c0_40 = arith.constant 0 : index
      %37 = vector.load %arg9[%c0_38, %c0_39, %c0_40] : memref<2x8x1xf32, #tpu.memory_space<vmem>>, vector<2x8x1xf32>
      %38 = tpu.reciprocal %37 {approx = true} : vector<2x8x1xf32> -> vector<2x8x1xf32>
      %39 = vector.broadcast %38 : vector<2x8x1xf32> to vector<2x8x8xf32>
      %40 = arith.mulf %36, %39 : vector<2x8x8xf32>
      %41 = arith.truncf %40 : vector<2x8x8xf32> to vector<2x8x8xbf16>
      %c0_41 = arith.constant 0 : index
      %c0_42 = arith.constant 0 : index
      %c0_43 = arith.constant 0 : index
      %c0_44 = arith.constant 0 : index
      %42 = vector.load %arg7[%c0_41, %c0_42, %c0_43, %c0_44] : memref<1x2x8x8xbf16, #tpu.memory_space<vmem>>, vector<1x2x8x8xbf16>
      %43 = vector.shape_cast %42 : vector<1x2x8x8xbf16> to vector<2x8x8xbf16>
      %44 = vector.shape_cast %41 : vector<2x8x8xbf16> to vector<1x2x8x8xbf16>
      tpu.vector_store %arg7[%c0_41, %c0_42, %c0_43, %c0_44], %44 {strides = array<i32>} : memref<1x2x8x8xbf16, #tpu.memory_space<vmem>>, vector<1x2x8x8xbf16>,
    } else {
    }
    return
  }
  func.func @transform_0(%arg0: i32, %arg1: i32, %arg2: i32, %arg3: i32) -> (i32, i32, i32, i32) {
    %c0_i32 = arith.constant 0 : i32
    %0 = arith.addi %c0_i32, %arg1 : i32
    %c0_i32_0 = arith.constant 0 : i32
    %c0_i32_1 = arith.constant 0 : i32
    return %arg0, %0, %arg2, %c0_i32_0 : i32, i32, i32, i32
  }
  func.func @transform_1(%arg0: i32, %arg1: i32, %arg2: i32, %arg3: i32) -> (i32, i32, i32, i32) {
    %c1_i32 = arith.constant 1 : i32
    %0 = arith.addi %c1_i32, %arg1 : i32
    %c0_i32 = arith.constant 0 : i32
    %c0_i32_0 = arith.constant 0 : i32
    return %arg0, %0, %arg3, %c0_i32 : i32, i32, i32, i32
  }
  func.func @transform_2(%arg0: i32, %arg1: i32, %arg2: i32, %arg3: i32) -> (i32, i32, i32, i32) {
    %c2_i32 = arith.constant 2 : i32
    %0 = arith.addi %c2_i32, %arg1 : i32
    %c0_i32 = arith.constant 0 : i32
    %c0_i32_0 = arith.constant 0 : i32
    return %arg0, %0, %arg3, %c0_i32 : i32, i32, i32, i32
  }
  func.func @transform_3(%arg0: i32, %arg1: i32, %arg2: i32, %arg3: i32) -> (i32, i32, i32, i32) {
    %c0_i32 = arith.constant 0 : i32
    %c0_i32_0 = arith.constant 0 : i32
    return %arg0, %arg1, %arg2, %c0_i32 : i32, i32, i32, i32
  }
}

module attributes {stable_mosaic.version = 11 : i64} {
  func.func @_head_proj_kernel(%arg0: i32, %arg1: i32, %arg2: i32, %arg3: i32, %arg4: memref<1x8x32xbf16, #tpu.memory_space<vmem>>, %arg5: memref<6x32x8xbf16, #tpu.memory_space<vmem>>, %arg6: memref<1x6x8x8xbf16, #tpu.memory_space<vmem>>, %arg7: memref<6x8x8xf32, #tpu.memory_space<vmem>>) attributes {dimension_semantics = [#tpu.dimension_semantics<parallel>, #tpu.dimension_semantics<parallel>, #tpu.dimension_semantics<parallel>, #tpu.dimension_semantics<arbitrary>], iteration_bounds = array<i64: 1, 2, 1, 1>, scalar_prefetch = 0 : i64, scratch_operands = 1 : i64, tpu.core_type = #tpu.core_type<tc>, window_params = [{transform_indices = @transform_0, window_bounds = array<i64: 1, 8, 32>}, {transform_indices = @transform_1, window_bounds = array<i64: 6, 32, 8>}, {transform_indices = @transform_2, window_bounds = array<i64: 1, 6, 8, 8>}]} {
    %c0_i32 = arith.constant 0 : i32
    %0 = arith.cmpi eq, %arg3, %c0_i32 : i32
    %1 = arith.extui %0 : i1 to i32
    %c0_i32_0 = arith.constant 0 : i32
    %2 = arith.cmpi ne, %1, %c0_i32_0 : i32
    scf.if %2 {
      %cst_59 = arith.constant 0.000000e+00 : f32
      %62 = vector.broadcast %cst_59 : f32 to vector<6x8x8xf32>
      %c0_60 = arith.constant 0 : index
      %c0_61 = arith.constant 0 : index
      %c0_62 = arith.constant 0 : index
      %63 = vector.load %arg7[%c0_60, %c0_61, %c0_62] : memref<6x8x8xf32, #tpu.memory_space<vmem>>, vector<6x8x8xf32>
      tpu.vector_store %arg7[%c0_60, %c0_61, %c0_62], %62 {strides = array<i32>} : memref<6x8x8xf32, #tpu.memory_space<vmem>>, vector<6x8x8xf32>,
    } else {
    }
    %c0 = arith.constant 0 : index
    %c0_1 = arith.constant 0 : index
    %c0_2 = arith.constant 0 : index
    %3 = vector.load %arg4[%c0, %c0_1, %c0_2] : memref<1x8x32xbf16, #tpu.memory_space<vmem>>, vector<1x8x32xbf16>
    %4 = vector.shape_cast %3 : vector<1x8x32xbf16> to vector<8x32xbf16>
    %c0_3 = arith.constant 0 : index
    %c0_4 = arith.constant 0 : index
    %c0_5 = arith.constant 0 : index
    %5 = vector.load %arg7[%c0_3, %c0_4, %c0_5] : memref<6x8x8xf32, #tpu.memory_space<vmem>>, vector<1x8x8xf32>
    %6 = vector.shape_cast %5 : vector<1x8x8xf32> to vector<8x8xf32>
    %c0_6 = arith.constant 0 : index
    %c0_7 = arith.constant 0 : index
    %c0_8 = arith.constant 0 : index
    %7 = vector.load %arg5[%c0_6, %c0_7, %c0_8] : memref<6x32x8xbf16, #tpu.memory_space<vmem>>, vector<1x32x8xbf16>
    %8 = vector.shape_cast %7 : vector<1x32x8xbf16> to vector<32x8xbf16>
    %cst = arith.constant dense<0.000000e+00> : vector<8x8xf32>
    %9 = tpu.matmul %4, %8, %cst {dimension_numbers = #tpu.dot_dimension_numbers<[1], [0], [0], [1], [0, 0, 1, 1], [], []>} : vector<8x32xbf16>, vector<32x8xbf16>, vector<8x8xf32> -> vector<8x8xf32>
    %10 = arith.addf %6, %9 : vector<8x8xf32>
    %c0_9 = arith.constant 0 : index
    %c0_10 = arith.constant 0 : index
    %c0_11 = arith.constant 0 : index
    %11 = vector.load %arg7[%c0_9, %c0_10, %c0_11] : memref<6x8x8xf32, #tpu.memory_space<vmem>>, vector<1x8x8xf32>
    %12 = vector.shape_cast %11 : vector<1x8x8xf32> to vector<8x8xf32>
    %13 = vector.shape_cast %10 : vector<8x8xf32> to vector<1x8x8xf32>
    tpu.vector_store %arg7[%c0_9, %c0_10, %c0_11], %13 {strides = array<i32>} : memref<6x8x8xf32, #tpu.memory_space<vmem>>, vector<1x8x8xf32>,
    %c1 = arith.constant 1 : index
    %c0_12 = arith.constant 0 : index
    %c0_13 = arith.constant 0 : index
    %14 = vector.load %arg7[%c1, %c0_12, %c0_13] : memref<6x8x8xf32, #tpu.memory_space<vmem>>, vector<1x8x8xf32>
    %15 = vector.shape_cast %14 : vector<1x8x8xf32> to vector<8x8xf32>
    %c1_14 = arith.constant 1 : index
    %c0_15 = arith.constant 0 : index
    %c0_16 = arith.constant 0 : index
    %16 = vector.load %arg5[%c1_14, %c0_15, %c0_16] : memref<6x32x8xbf16, #tpu.memory_space<vmem>>, vector<1x32x8xbf16>
    %17 = vector.shape_cast %16 : vector<1x32x8xbf16> to vector<32x8xbf16>
    %cst_17 = arith.constant dense<0.000000e+00> : vector<8x8xf32>
    %18 = tpu.matmul %4, %17, %cst_17 {dimension_numbers = #tpu.dot_dimension_numbers<[1], [0], [0], [1], [0, 0, 1, 1], [], []>} : vector<8x32xbf16>, vector<32x8xbf16>, vector<8x8xf32> -> vector<8x8xf32>
    %19 = arith.addf %15, %18 : vector<8x8xf32>
    %c1_18 = arith.constant 1 : index
    %c0_19 = arith.constant 0 : index
    %c0_20 = arith.constant 0 : index
    %20 = vector.load %arg7[%c1_18, %c0_19, %c0_20] : memref<6x8x8xf32, #tpu.memory_space<vmem>>, vector<1x8x8xf32>
    %21 = vector.shape_cast %20 : vector<1x8x8xf32> to vector<8x8xf32>
    %22 = vector.shape_cast %19 : vector<8x8xf32> to vector<1x8x8xf32>
    tpu.vector_store %arg7[%c1_18, %c0_19, %c0_20], %22 {strides = array<i32>} : memref<6x8x8xf32, #tpu.memory_space<vmem>>, vector<1x8x8xf32>,
    %c2 = arith.constant 2 : index
    %c0_21 = arith.constant 0 : index
    %c0_22 = arith.constant 0 : index
    %23 = vector.load %arg7[%c2, %c0_21, %c0_22] : memref<6x8x8xf32, #tpu.memory_space<vmem>>, vector<1x8x8xf32>
    %24 = vector.shape_cast %23 : vector<1x8x8xf32> to vector<8x8xf32>
    %c2_23 = arith.constant 2 : index
    %c0_24 = arith.constant 0 : index
    %c0_25 = arith.constant 0 : index
    %25 = vector.load %arg5[%c2_23, %c0_24, %c0_25] : memref<6x32x8xbf16, #tpu.memory_space<vmem>>, vector<1x32x8xbf16>
    %26 = vector.shape_cast %25 : vector<1x32x8xbf16> to vector<32x8xbf16>
    %cst_26 = arith.constant dense<0.000000e+00> : vector<8x8xf32>
    %27 = tpu.matmul %4, %26, %cst_26 {dimension_numbers = #tpu.dot_dimension_numbers<[1], [0], [0], [1], [0, 0, 1, 1], [], []>} : vector<8x32xbf16>, vector<32x8xbf16>, vector<8x8xf32> -> vector<8x8xf32>
    %28 = arith.addf %24, %27 : vector<8x8xf32>
    %c2_27 = arith.constant 2 : index
    %c0_28 = arith.constant 0 : index
    %c0_29 = arith.constant 0 : index
    %29 = vector.load %arg7[%c2_27, %c0_28, %c0_29] : memref<6x8x8xf32, #tpu.memory_space<vmem>>, vector<1x8x8xf32>
    %30 = vector.shape_cast %29 : vector<1x8x8xf32> to vector<8x8xf32>
    %31 = vector.shape_cast %28 : vector<8x8xf32> to vector<1x8x8xf32>
    tpu.vector_store %arg7[%c2_27, %c0_28, %c0_29], %31 {strides = array<i32>} : memref<6x8x8xf32, #tpu.memory_space<vmem>>, vector<1x8x8xf32>,
    %c3 = arith.constant 3 : index
    %c0_30 = arith.constant 0 : index
    %c0_31 = arith.constant 0 : index
    %32 = vector.load %arg7[%c3, %c0_30, %c0_31] : memref<6x8x8xf32, #tpu.memory_space<vmem>>, vector<1x8x8xf32>
    %33 = vector.shape_cast %32 : vector<1x8x8xf32> to vector<8x8xf32>
    %c3_32 = arith.constant 3 : index
    %c0_33 = arith.constant 0 : index
    %c0_34 = arith.constant 0 : index
    %34 = vector.load %arg5[%c3_32, %c0_33, %c0_34] : memref<6x32x8xbf16, #tpu.memory_space<vmem>>, vector<1x32x8xbf16>
    %35 = vector.shape_cast %34 : vector<1x32x8xbf16> to vector<32x8xbf16>
    %cst_35 = arith.constant dense<0.000000e+00> : vector<8x8xf32>
    %36 = tpu.matmul %4, %35, %cst_35 {dimension_numbers = #tpu.dot_dimension_numbers<[1], [0], [0], [1], [0, 0, 1, 1], [], []>} : vector<8x32xbf16>, vector<32x8xbf16>, vector<8x8xf32> -> vector<8x8xf32>
    %37 = arith.addf %33, %36 : vector<8x8xf32>
    %c3_36 = arith.constant 3 : index
    %c0_37 = arith.constant 0 : index
    %c0_38 = arith.constant 0 : index
    %38 = vector.load %arg7[%c3_36, %c0_37, %c0_38] : memref<6x8x8xf32, #tpu.memory_space<vmem>>, vector<1x8x8xf32>
    %39 = vector.shape_cast %38 : vector<1x8x8xf32> to vector<8x8xf32>
    %40 = vector.shape_cast %37 : vector<8x8xf32> to vector<1x8x8xf32>
    tpu.vector_store %arg7[%c3_36, %c0_37, %c0_38], %40 {strides = array<i32>} : memref<6x8x8xf32, #tpu.memory_space<vmem>>, vector<1x8x8xf32>,
    %c4 = arith.constant 4 : index
    %c0_39 = arith.constant 0 : index
    %c0_40 = arith.constant 0 : index
    %41 = vector.load %arg7[%c4, %c0_39, %c0_40] : memref<6x8x8xf32, #tpu.memory_space<vmem>>, vector<1x8x8xf32>
    %42 = vector.shape_cast %41 : vector<1x8x8xf32> to vector<8x8xf32>
    %c4_41 = arith.constant 4 : index
    %c0_42 = arith.constant 0 : index
    %c0_43 = arith.constant 0 : index
    %43 = vector.load %arg5[%c4_41, %c0_42, %c0_43] : memref<6x32x8xbf16, #tpu.memory_space<vmem>>, vector<1x32x8xbf16>
    %44 = vector.shape_cast %43 : vector<1x32x8xbf16> to vector<32x8xbf16>
    %cst_44 = arith.constant dense<0.000000e+00> : vector<8x8xf32>
    %45 = tpu.matmul %4, %44, %cst_44 {dimension_numbers = #tpu.dot_dimension_numbers<[1], [0], [0], [1], [0, 0, 1, 1], [], []>} : vector<8x32xbf16>, vector<32x8xbf16>, vector<8x8xf32> -> vector<8x8xf32>
    %46 = arith.addf %42, %45 : vector<8x8xf32>
    %c4_45 = arith.constant 4 : index
    %c0_46 = arith.constant 0 : index
    %c0_47 = arith.constant 0 : index
    %47 = vector.load %arg7[%c4_45, %c0_46, %c0_47] : memref<6x8x8xf32, #tpu.memory_space<vmem>>, vector<1x8x8xf32>
    %48 = vector.shape_cast %47 : vector<1x8x8xf32> to vector<8x8xf32>
    %49 = vector.shape_cast %46 : vector<8x8xf32> to vector<1x8x8xf32>
    tpu.vector_store %arg7[%c4_45, %c0_46, %c0_47], %49 {strides = array<i32>} : memref<6x8x8xf32, #tpu.memory_space<vmem>>, vector<1x8x8xf32>,
    %c5 = arith.constant 5 : index
    %c0_48 = arith.constant 0 : index
    %c0_49 = arith.constant 0 : index
    %50 = vector.load %arg7[%c5, %c0_48, %c0_49] : memref<6x8x8xf32, #tpu.memory_space<vmem>>, vector<1x8x8xf32>
    %51 = vector.shape_cast %50 : vector<1x8x8xf32> to vector<8x8xf32>
    %c5_50 = arith.constant 5 : index
    %c0_51 = arith.constant 0 : index
    %c0_52 = arith.constant 0 : index
    %52 = vector.load %arg5[%c5_50, %c0_51, %c0_52] : memref<6x32x8xbf16, #tpu.memory_space<vmem>>, vector<1x32x8xbf16>
    %53 = vector.shape_cast %52 : vector<1x32x8xbf16> to vector<32x8xbf16>
    %cst_53 = arith.constant dense<0.000000e+00> : vector<8x8xf32>
    %54 = tpu.matmul %4, %53, %cst_53 {dimension_numbers = #tpu.dot_dimension_numbers<[1], [0], [0], [1], [0, 0, 1, 1], [], []>} : vector<8x32xbf16>, vector<32x8xbf16>, vector<8x8xf32> -> vector<8x8xf32>
    %55 = arith.addf %51, %54 : vector<8x8xf32>
    %c5_54 = arith.constant 5 : index
    %c0_55 = arith.constant 0 : index
    %c0_56 = arith.constant 0 : index
    %56 = vector.load %arg7[%c5_54, %c0_55, %c0_56] : memref<6x8x8xf32, #tpu.memory_space<vmem>>, vector<1x8x8xf32>
    %57 = vector.shape_cast %56 : vector<1x8x8xf32> to vector<8x8xf32>
    %58 = vector.shape_cast %55 : vector<8x8xf32> to vector<1x8x8xf32>
    tpu.vector_store %arg7[%c5_54, %c0_55, %c0_56], %58 {strides = array<i32>} : memref<6x8x8xf32, #tpu.memory_space<vmem>>, vector<1x8x8xf32>,
    %c0_i32_57 = arith.constant 0 : i32
    %59 = arith.cmpi eq, %arg3, %c0_i32_57 : i32
    %60 = arith.extui %59 : i1 to i32
    %c0_i32_58 = arith.constant 0 : i32
    %61 = arith.cmpi ne, %60, %c0_i32_58 : i32
    scf.if %61 {
      %c0_59 = arith.constant 0 : index
      %c0_60 = arith.constant 0 : index
      %c0_61 = arith.constant 0 : index
      %62 = vector.load %arg7[%c0_59, %c0_60, %c0_61] : memref<6x8x8xf32, #tpu.memory_space<vmem>>, vector<6x8x8xf32>
      %63 = arith.truncf %62 : vector<6x8x8xf32> to vector<6x8x8xbf16>
      %c0_62 = arith.constant 0 : index
      %c0_63 = arith.constant 0 : index
      %c0_64 = arith.constant 0 : index
      %c0_65 = arith.constant 0 : index
      %64 = vector.load %arg6[%c0_62, %c0_63, %c0_64, %c0_65] : memref<1x6x8x8xbf16, #tpu.memory_space<vmem>>, vector<1x6x8x8xbf16>
      %65 = vector.shape_cast %64 : vector<1x6x8x8xbf16> to vector<6x8x8xbf16>
      %66 = vector.shape_cast %63 : vector<6x8x8xbf16> to vector<1x6x8x8xbf16>
      tpu.vector_store %arg6[%c0_62, %c0_63, %c0_64, %c0_65], %66 {strides = array<i32>} : memref<1x6x8x8xbf16, #tpu.memory_space<vmem>>, vector<1x6x8x8xbf16>,
    } else {
    }
    return
  }
  func.func @transform_0(%arg0: i32, %arg1: i32, %arg2: i32, %arg3: i32) -> (i32, i32, i32) {
    %c0_i32 = arith.constant 0 : i32
    return %arg1, %arg2, %arg3 : i32, i32, i32
  }
  func.func @transform_1(%arg0: i32, %arg1: i32, %arg2: i32, %arg3: i32) -> (i32, i32, i32) {
    %c0_i32 = arith.constant 0 : i32
    %c0_i32_0 = arith.constant 0 : i32
    return %arg0, %arg3, %c0_i32 : i32, i32, i32
  }
  func.func @transform_2(%arg0: i32, %arg1: i32, %arg2: i32, %arg3: i32) -> (i32, i32, i32, i32) {
    %c0_i32 = arith.constant 0 : i32
    %c0_i32_0 = arith.constant 0 : i32
    return %arg1, %arg0, %arg2, %c0_i32 : i32, i32, i32, i32
  }
}

module attributes {stable_mosaic.version = 11 : i64} {
  func.func @_oproj_kernel(%arg0: i32, %arg1: i32, %arg2: i32, %arg3: i32, %arg4: memref<1x2x8x8xbf16, #tpu.memory_space<vmem>>, %arg5: memref<2x8x32xbf16, #tpu.memory_space<vmem>>, %arg6: memref<1x8x32xf32, #tpu.memory_space<vmem>>, %arg7: memref<8x32xf32, #tpu.memory_space<vmem>>) attributes {dimension_semantics = [#tpu.dimension_semantics<parallel>, #tpu.dimension_semantics<parallel>, #tpu.dimension_semantics<parallel>, #tpu.dimension_semantics<arbitrary>], iteration_bounds = array<i64: 2, 1, 1, 1>, scalar_prefetch = 0 : i64, scratch_operands = 1 : i64, tpu.core_type = #tpu.core_type<tc>, window_params = [{transform_indices = @transform_0, window_bounds = array<i64: 1, 2, 8, 8>}, {transform_indices = @transform_1, window_bounds = array<i64: 2, 8, 32>}, {transform_indices = @transform_2, window_bounds = array<i64: 1, 8, 32>}]} {
    %c0_i32 = arith.constant 0 : i32
    %0 = arith.cmpi eq, %arg3, %c0_i32 : i32
    %1 = arith.extui %0 : i1 to i32
    %c0_i32_0 = arith.constant 0 : i32
    %2 = arith.cmpi ne, %1, %c0_i32_0 : i32
    scf.if %2 {
      %cst_16 = arith.constant 0.000000e+00 : f32
      %22 = vector.broadcast %cst_16 : f32 to vector<8x32xf32>
      %c0_17 = arith.constant 0 : index
      %c0_18 = arith.constant 0 : index
      %23 = vector.load %arg7[%c0_17, %c0_18] : memref<8x32xf32, #tpu.memory_space<vmem>>, vector<8x32xf32>
      tpu.vector_store %arg7[%c0_17, %c0_18], %22 {strides = array<i32>} : memref<8x32xf32, #tpu.memory_space<vmem>>, vector<8x32xf32>,
    } else {
    }
    %c0 = arith.constant 0 : index
    %c0_1 = arith.constant 0 : index
    %c0_2 = arith.constant 0 : index
    %c0_3 = arith.constant 0 : index
    %3 = vector.load %arg4[%c0, %c0_1, %c0_2, %c0_3] : memref<1x2x8x8xbf16, #tpu.memory_space<vmem>>, vector<1x2x8x8xbf16>
    %4 = vector.shape_cast %3 : vector<1x2x8x8xbf16> to vector<2x8x8xbf16>
    %c0_4 = arith.constant 0 : index
    %c0_5 = arith.constant 0 : index
    %5 = vector.load %arg7[%c0_4, %c0_5] : memref<8x32xf32, #tpu.memory_space<vmem>>, vector<8x32xf32>
    %6 = vector.extract_strided_slice %4 {offsets = [0, 0, 0], sizes = [1, 8, 8], strides = [1, 1, 1]} : vector<2x8x8xbf16> to vector<1x8x8xbf16>
    %7 = vector.shape_cast %6 : vector<1x8x8xbf16> to vector<8x8xbf16>
    %c0_6 = arith.constant 0 : index
    %c0_7 = arith.constant 0 : index
    %c0_8 = arith.constant 0 : index
    %8 = vector.load %arg5[%c0_6, %c0_7, %c0_8] : memref<2x8x32xbf16, #tpu.memory_space<vmem>>, vector<1x8x32xbf16>
    %9 = vector.shape_cast %8 : vector<1x8x32xbf16> to vector<8x32xbf16>
    %cst = arith.constant dense<0.000000e+00> : vector<8x32xf32>
    %10 = tpu.matmul %7, %9, %cst {dimension_numbers = #tpu.dot_dimension_numbers<[1], [0], [0], [1], [0, 0, 1, 1], [], []>} : vector<8x8xbf16>, vector<8x32xbf16>, vector<8x32xf32> -> vector<8x32xf32>
    %11 = arith.addf %5, %10 : vector<8x32xf32>
    %12 = vector.extract_strided_slice %4 {offsets = [1, 0, 0], sizes = [1, 8, 8], strides = [1, 1, 1]} : vector<2x8x8xbf16> to vector<1x8x8xbf16>
    %13 = vector.shape_cast %12 : vector<1x8x8xbf16> to vector<8x8xbf16>
    %c1 = arith.constant 1 : index
    %c0_9 = arith.constant 0 : index
    %c0_10 = arith.constant 0 : index
    %14 = vector.load %arg5[%c1, %c0_9, %c0_10] : memref<2x8x32xbf16, #tpu.memory_space<vmem>>, vector<1x8x32xbf16>
    %15 = vector.shape_cast %14 : vector<1x8x32xbf16> to vector<8x32xbf16>
    %cst_11 = arith.constant dense<0.000000e+00> : vector<8x32xf32>
    %16 = tpu.matmul %13, %15, %cst_11 {dimension_numbers = #tpu.dot_dimension_numbers<[1], [0], [0], [1], [0, 0, 1, 1], [], []>} : vector<8x8xbf16>, vector<8x32xbf16>, vector<8x32xf32> -> vector<8x32xf32>
    %17 = arith.addf %11, %16 : vector<8x32xf32>
    %c0_12 = arith.constant 0 : index
    %c0_13 = arith.constant 0 : index
    %18 = vector.load %arg7[%c0_12, %c0_13] : memref<8x32xf32, #tpu.memory_space<vmem>>, vector<8x32xf32>
    tpu.vector_store %arg7[%c0_12, %c0_13], %17 {strides = array<i32>} : memref<8x32xf32, #tpu.memory_space<vmem>>, vector<8x32xf32>,
    %c0_i32_14 = arith.constant 0 : i32
    %19 = arith.cmpi eq, %arg3, %c0_i32_14 : i32
    %20 = arith.extui %19 : i1 to i32
    %c0_i32_15 = arith.constant 0 : i32
    %21 = arith.cmpi ne, %20, %c0_i32_15 : i32
    scf.if %21 {
      %c0_16 = arith.constant 0 : index
      %c0_17 = arith.constant 0 : index
      %22 = vector.load %arg7[%c0_16, %c0_17] : memref<8x32xf32, #tpu.memory_space<vmem>>, vector<8x32xf32>
      %c0_18 = arith.constant 0 : index
      %c0_19 = arith.constant 0 : index
      %c0_20 = arith.constant 0 : index
      %23 = vector.load %arg6[%c0_18, %c0_19, %c0_20] : memref<1x8x32xf32, #tpu.memory_space<vmem>>, vector<1x8x32xf32>
      %24 = vector.shape_cast %23 : vector<1x8x32xf32> to vector<8x32xf32>
      %25 = vector.shape_cast %22 : vector<8x32xf32> to vector<1x8x32xf32>
      tpu.vector_store %arg6[%c0_18, %c0_19, %c0_20], %25 {strides = array<i32>} : memref<1x8x32xf32, #tpu.memory_space<vmem>>, vector<1x8x32xf32>,
    } else {
    }
    return
  }
  func.func @transform_0(%arg0: i32, %arg1: i32, %arg2: i32, %arg3: i32) -> (i32, i32, i32, i32) {
    %c0_i32 = arith.constant 0 : i32
    %c0_i32_0 = arith.constant 0 : i32
    return %arg0, %arg3, %arg1, %c0_i32 : i32, i32, i32, i32
  }
  func.func @transform_1(%arg0: i32, %arg1: i32, %arg2: i32, %arg3: i32) -> (i32, i32, i32) {
    %c0_i32 = arith.constant 0 : i32
    %c0_i32_0 = arith.constant 0 : i32
    return %arg3, %c0_i32, %arg2 : i32, i32, i32
  }
  func.func @transform_2(%arg0: i32, %arg1: i32, %arg2: i32, %arg3: i32) -> (i32, i32, i32) {
    %c0_i32 = arith.constant 0 : i32
    return %arg0, %arg1, %arg2 : i32, i32, i32
  }
}

module attributes {stable_mosaic.version = 11 : i64} {
  func.func @_head_proj_kernel(%arg0: i32, %arg1: i32, %arg2: i32, %arg3: i32, %arg4: memref<1x8x32xbf16, #tpu.memory_space<vmem>>, %arg5: memref<2x32x8xbf16, #tpu.memory_space<vmem>>, %arg6: memref<1x2x8x8xbf16, #tpu.memory_space<vmem>>, %arg7: memref<2x8x8xf32, #tpu.memory_space<vmem>>) attributes {dimension_semantics = [#tpu.dimension_semantics<parallel>, #tpu.dimension_semantics<parallel>, #tpu.dimension_semantics<parallel>, #tpu.dimension_semantics<arbitrary>], iteration_bounds = array<i64: 1, 2, 1, 1>, scalar_prefetch = 0 : i64, scratch_operands = 1 : i64, tpu.core_type = #tpu.core_type<tc>, window_params = [{transform_indices = @transform_0, window_bounds = array<i64: 1, 8, 32>}, {transform_indices = @transform_1, window_bounds = array<i64: 2, 32, 8>}, {transform_indices = @transform_2, window_bounds = array<i64: 1, 2, 8, 8>}]} {
    %c0_i32 = arith.constant 0 : i32
    %0 = arith.cmpi eq, %arg3, %c0_i32 : i32
    %1 = arith.extui %0 : i1 to i32
    %c0_i32_0 = arith.constant 0 : i32
    %2 = arith.cmpi ne, %1, %c0_i32_0 : i32
    scf.if %2 {
      %cst_23 = arith.constant 0.000000e+00 : f32
      %26 = vector.broadcast %cst_23 : f32 to vector<2x8x8xf32>
      %c0_24 = arith.constant 0 : index
      %c0_25 = arith.constant 0 : index
      %c0_26 = arith.constant 0 : index
      %27 = vector.load %arg7[%c0_24, %c0_25, %c0_26] : memref<2x8x8xf32, #tpu.memory_space<vmem>>, vector<2x8x8xf32>
      tpu.vector_store %arg7[%c0_24, %c0_25, %c0_26], %26 {strides = array<i32>} : memref<2x8x8xf32, #tpu.memory_space<vmem>>, vector<2x8x8xf32>,
    } else {
    }
    %c0 = arith.constant 0 : index
    %c0_1 = arith.constant 0 : index
    %c0_2 = arith.constant 0 : index
    %3 = vector.load %arg4[%c0, %c0_1, %c0_2] : memref<1x8x32xbf16, #tpu.memory_space<vmem>>, vector<1x8x32xbf16>
    %4 = vector.shape_cast %3 : vector<1x8x32xbf16> to vector<8x32xbf16>
    %c0_3 = arith.constant 0 : index
    %c0_4 = arith.constant 0 : index
    %c0_5 = arith.constant 0 : index
    %5 = vector.load %arg7[%c0_3, %c0_4, %c0_5] : memref<2x8x8xf32, #tpu.memory_space<vmem>>, vector<1x8x8xf32>
    %6 = vector.shape_cast %5 : vector<1x8x8xf32> to vector<8x8xf32>
    %c0_6 = arith.constant 0 : index
    %c0_7 = arith.constant 0 : index
    %c0_8 = arith.constant 0 : index
    %7 = vector.load %arg5[%c0_6, %c0_7, %c0_8] : memref<2x32x8xbf16, #tpu.memory_space<vmem>>, vector<1x32x8xbf16>
    %8 = vector.shape_cast %7 : vector<1x32x8xbf16> to vector<32x8xbf16>
    %cst = arith.constant dense<0.000000e+00> : vector<8x8xf32>
    %9 = tpu.matmul %4, %8, %cst {dimension_numbers = #tpu.dot_dimension_numbers<[1], [0], [0], [1], [0, 0, 1, 1], [], []>} : vector<8x32xbf16>, vector<32x8xbf16>, vector<8x8xf32> -> vector<8x8xf32>
    %10 = arith.addf %6, %9 : vector<8x8xf32>
    %c0_9 = arith.constant 0 : index
    %c0_10 = arith.constant 0 : index
    %c0_11 = arith.constant 0 : index
    %11 = vector.load %arg7[%c0_9, %c0_10, %c0_11] : memref<2x8x8xf32, #tpu.memory_space<vmem>>, vector<1x8x8xf32>
    %12 = vector.shape_cast %11 : vector<1x8x8xf32> to vector<8x8xf32>
    %13 = vector.shape_cast %10 : vector<8x8xf32> to vector<1x8x8xf32>
    tpu.vector_store %arg7[%c0_9, %c0_10, %c0_11], %13 {strides = array<i32>} : memref<2x8x8xf32, #tpu.memory_space<vmem>>, vector<1x8x8xf32>,
    %c1 = arith.constant 1 : index
    %c0_12 = arith.constant 0 : index
    %c0_13 = arith.constant 0 : index
    %14 = vector.load %arg7[%c1, %c0_12, %c0_13] : memref<2x8x8xf32, #tpu.memory_space<vmem>>, vector<1x8x8xf32>
    %15 = vector.shape_cast %14 : vector<1x8x8xf32> to vector<8x8xf32>
    %c1_14 = arith.constant 1 : index
    %c0_15 = arith.constant 0 : index
    %c0_16 = arith.constant 0 : index
    %16 = vector.load %arg5[%c1_14, %c0_15, %c0_16] : memref<2x32x8xbf16, #tpu.memory_space<vmem>>, vector<1x32x8xbf16>
    %17 = vector.shape_cast %16 : vector<1x32x8xbf16> to vector<32x8xbf16>
    %cst_17 = arith.constant dense<0.000000e+00> : vector<8x8xf32>
    %18 = tpu.matmul %4, %17, %cst_17 {dimension_numbers = #tpu.dot_dimension_numbers<[1], [0], [0], [1], [0, 0, 1, 1], [], []>} : vector<8x32xbf16>, vector<32x8xbf16>, vector<8x8xf32> -> vector<8x8xf32>
    %19 = arith.addf %15, %18 : vector<8x8xf32>
    %c1_18 = arith.constant 1 : index
    %c0_19 = arith.constant 0 : index
    %c0_20 = arith.constant 0 : index
    %20 = vector.load %arg7[%c1_18, %c0_19, %c0_20] : memref<2x8x8xf32, #tpu.memory_space<vmem>>, vector<1x8x8xf32>
    %21 = vector.shape_cast %20 : vector<1x8x8xf32> to vector<8x8xf32>
    %22 = vector.shape_cast %19 : vector<8x8xf32> to vector<1x8x8xf32>
    tpu.vector_store %arg7[%c1_18, %c0_19, %c0_20], %22 {strides = array<i32>} : memref<2x8x8xf32, #tpu.memory_space<vmem>>, vector<1x8x8xf32>,
    %c0_i32_21 = arith.constant 0 : i32
    %23 = arith.cmpi eq, %arg3, %c0_i32_21 : i32
    %24 = arith.extui %23 : i1 to i32
    %c0_i32_22 = arith.constant 0 : i32
    %25 = arith.cmpi ne, %24, %c0_i32_22 : i32
    scf.if %25 {
      %c0_23 = arith.constant 0 : index
      %c0_24 = arith.constant 0 : index
      %c0_25 = arith.constant 0 : index
      %26 = vector.load %arg7[%c0_23, %c0_24, %c0_25] : memref<2x8x8xf32, #tpu.memory_space<vmem>>, vector<2x8x8xf32>
      %27 = arith.truncf %26 : vector<2x8x8xf32> to vector<2x8x8xbf16>
      %c0_26 = arith.constant 0 : index
      %c0_27 = arith.constant 0 : index
      %c0_28 = arith.constant 0 : index
      %c0_29 = arith.constant 0 : index
      %28 = vector.load %arg6[%c0_26, %c0_27, %c0_28, %c0_29] : memref<1x2x8x8xbf16, #tpu.memory_space<vmem>>, vector<1x2x8x8xbf16>
      %29 = vector.shape_cast %28 : vector<1x2x8x8xbf16> to vector<2x8x8xbf16>
      %30 = vector.shape_cast %27 : vector<2x8x8xbf16> to vector<1x2x8x8xbf16>
      tpu.vector_store %arg6[%c0_26, %c0_27, %c0_28, %c0_29], %30 {strides = array<i32>} : memref<1x2x8x8xbf16, #tpu.memory_space<vmem>>, vector<1x2x8x8xbf16>,
    } else {
    }
    return
  }
  func.func @transform_0(%arg0: i32, %arg1: i32, %arg2: i32, %arg3: i32) -> (i32, i32, i32) {
    %c0_i32 = arith.constant 0 : i32
    return %arg1, %arg2, %arg3 : i32, i32, i32
  }
  func.func @transform_1(%arg0: i32, %arg1: i32, %arg2: i32, %arg3: i32) -> (i32, i32, i32) {
    %c0_i32 = arith.constant 0 : i32
    %c0_i32_0 = arith.constant 0 : i32
    return %arg0, %arg3, %c0_i32 : i32, i32, i32
  }
  func.func @transform_2(%arg0: i32, %arg1: i32, %arg2: i32, %arg3: i32) -> (i32, i32, i32, i32) {
    %c0_i32 = arith.constant 0 : i32
    %c0_i32_0 = arith.constant 0 : i32
    return %arg1, %arg0, %arg2, %c0_i32 : i32, i32, i32, i32
  }
}

module attributes {stable_mosaic.version = 11 : i64} {
  func.func @_head_proj_kernel(%arg0: i32, %arg1: i32, %arg2: i32, %arg3: i32, %arg4: memref<1x8x32xbf16, #tpu.memory_space<vmem>>, %arg5: memref<4x32x8xbf16, #tpu.memory_space<vmem>>, %arg6: memref<1x4x8x8xbf16, #tpu.memory_space<vmem>>, %arg7: memref<4x8x8xf32, #tpu.memory_space<vmem>>) attributes {dimension_semantics = [#tpu.dimension_semantics<parallel>, #tpu.dimension_semantics<parallel>, #tpu.dimension_semantics<parallel>, #tpu.dimension_semantics<arbitrary>], iteration_bounds = array<i64: 1, 2, 1, 1>, scalar_prefetch = 0 : i64, scratch_operands = 1 : i64, tpu.core_type = #tpu.core_type<tc>, window_params = [{transform_indices = @transform_0, window_bounds = array<i64: 1, 8, 32>}, {transform_indices = @transform_1, window_bounds = array<i64: 4, 32, 8>}, {transform_indices = @transform_2, window_bounds = array<i64: 1, 4, 8, 8>}]} {
    %c0_i32 = arith.constant 0 : i32
    %0 = arith.cmpi eq, %arg3, %c0_i32 : i32
    %1 = arith.extui %0 : i1 to i32
    %c0_i32_0 = arith.constant 0 : i32
    %2 = arith.cmpi ne, %1, %c0_i32_0 : i32
    scf.if %2 {
      %cst_41 = arith.constant 0.000000e+00 : f32
      %44 = vector.broadcast %cst_41 : f32 to vector<4x8x8xf32>
      %c0_42 = arith.constant 0 : index
      %c0_43 = arith.constant 0 : index
      %c0_44 = arith.constant 0 : index
      %45 = vector.load %arg7[%c0_42, %c0_43, %c0_44] : memref<4x8x8xf32, #tpu.memory_space<vmem>>, vector<4x8x8xf32>
      tpu.vector_store %arg7[%c0_42, %c0_43, %c0_44], %44 {strides = array<i32>} : memref<4x8x8xf32, #tpu.memory_space<vmem>>, vector<4x8x8xf32>,
    } else {
    }
    %c0 = arith.constant 0 : index
    %c0_1 = arith.constant 0 : index
    %c0_2 = arith.constant 0 : index
    %3 = vector.load %arg4[%c0, %c0_1, %c0_2] : memref<1x8x32xbf16, #tpu.memory_space<vmem>>, vector<1x8x32xbf16>
    %4 = vector.shape_cast %3 : vector<1x8x32xbf16> to vector<8x32xbf16>
    %c0_3 = arith.constant 0 : index
    %c0_4 = arith.constant 0 : index
    %c0_5 = arith.constant 0 : index
    %5 = vector.load %arg7[%c0_3, %c0_4, %c0_5] : memref<4x8x8xf32, #tpu.memory_space<vmem>>, vector<1x8x8xf32>
    %6 = vector.shape_cast %5 : vector<1x8x8xf32> to vector<8x8xf32>
    %c0_6 = arith.constant 0 : index
    %c0_7 = arith.constant 0 : index
    %c0_8 = arith.constant 0 : index
    %7 = vector.load %arg5[%c0_6, %c0_7, %c0_8] : memref<4x32x8xbf16, #tpu.memory_space<vmem>>, vector<1x32x8xbf16>
    %8 = vector.shape_cast %7 : vector<1x32x8xbf16> to vector<32x8xbf16>
    %cst = arith.constant dense<0.000000e+00> : vector<8x8xf32>
    %9 = tpu.matmul %4, %8, %cst {dimension_numbers = #tpu.dot_dimension_numbers<[1], [0], [0], [1], [0, 0, 1, 1], [], []>} : vector<8x32xbf16>, vector<32x8xbf16>, vector<8x8xf32> -> vector<8x8xf32>
    %10 = arith.addf %6, %9 : vector<8x8xf32>
    %c0_9 = arith.constant 0 : index
    %c0_10 = arith.constant 0 : index
    %c0_11 = arith.constant 0 : index
    %11 = vector.load %arg7[%c0_9, %c0_10, %c0_11] : memref<4x8x8xf32, #tpu.memory_space<vmem>>, vector<1x8x8xf32>
    %12 = vector.shape_cast %11 : vector<1x8x8xf32> to vector<8x8xf32>
    %13 = vector.shape_cast %10 : vector<8x8xf32> to vector<1x8x8xf32>
    tpu.vector_store %arg7[%c0_9, %c0_10, %c0_11], %13 {strides = array<i32>} : memref<4x8x8xf32, #tpu.memory_space<vmem>>, vector<1x8x8xf32>,
    %c1 = arith.constant 1 : index
    %c0_12 = arith.constant 0 : index
    %c0_13 = arith.constant 0 : index
    %14 = vector.load %arg7[%c1, %c0_12, %c0_13] : memref<4x8x8xf32, #tpu.memory_space<vmem>>, vector<1x8x8xf32>
    %15 = vector.shape_cast %14 : vector<1x8x8xf32> to vector<8x8xf32>
    %c1_14 = arith.constant 1 : index
    %c0_15 = arith.constant 0 : index
    %c0_16 = arith.constant 0 : index
    %16 = vector.load %arg5[%c1_14, %c0_15, %c0_16] : memref<4x32x8xbf16, #tpu.memory_space<vmem>>, vector<1x32x8xbf16>
    %17 = vector.shape_cast %16 : vector<1x32x8xbf16> to vector<32x8xbf16>
    %cst_17 = arith.constant dense<0.000000e+00> : vector<8x8xf32>
    %18 = tpu.matmul %4, %17, %cst_17 {dimension_numbers = #tpu.dot_dimension_numbers<[1], [0], [0], [1], [0, 0, 1, 1], [], []>} : vector<8x32xbf16>, vector<32x8xbf16>, vector<8x8xf32> -> vector<8x8xf32>
    %19 = arith.addf %15, %18 : vector<8x8xf32>
    %c1_18 = arith.constant 1 : index
    %c0_19 = arith.constant 0 : index
    %c0_20 = arith.constant 0 : index
    %20 = vector.load %arg7[%c1_18, %c0_19, %c0_20] : memref<4x8x8xf32, #tpu.memory_space<vmem>>, vector<1x8x8xf32>
    %21 = vector.shape_cast %20 : vector<1x8x8xf32> to vector<8x8xf32>
    %22 = vector.shape_cast %19 : vector<8x8xf32> to vector<1x8x8xf32>
    tpu.vector_store %arg7[%c1_18, %c0_19, %c0_20], %22 {strides = array<i32>} : memref<4x8x8xf32, #tpu.memory_space<vmem>>, vector<1x8x8xf32>,
    %c2 = arith.constant 2 : index
    %c0_21 = arith.constant 0 : index
    %c0_22 = arith.constant 0 : index
    %23 = vector.load %arg7[%c2, %c0_21, %c0_22] : memref<4x8x8xf32, #tpu.memory_space<vmem>>, vector<1x8x8xf32>
    %24 = vector.shape_cast %23 : vector<1x8x8xf32> to vector<8x8xf32>
    %c2_23 = arith.constant 2 : index
    %c0_24 = arith.constant 0 : index
    %c0_25 = arith.constant 0 : index
    %25 = vector.load %arg5[%c2_23, %c0_24, %c0_25] : memref<4x32x8xbf16, #tpu.memory_space<vmem>>, vector<1x32x8xbf16>
    %26 = vector.shape_cast %25 : vector<1x32x8xbf16> to vector<32x8xbf16>
    %cst_26 = arith.constant dense<0.000000e+00> : vector<8x8xf32>
    %27 = tpu.matmul %4, %26, %cst_26 {dimension_numbers = #tpu.dot_dimension_numbers<[1], [0], [0], [1], [0, 0, 1, 1], [], []>} : vector<8x32xbf16>, vector<32x8xbf16>, vector<8x8xf32> -> vector<8x8xf32>
    %28 = arith.addf %24, %27 : vector<8x8xf32>
    %c2_27 = arith.constant 2 : index
    %c0_28 = arith.constant 0 : index
    %c0_29 = arith.constant 0 : index
    %29 = vector.load %arg7[%c2_27, %c0_28, %c0_29] : memref<4x8x8xf32, #tpu.memory_space<vmem>>, vector<1x8x8xf32>
    %30 = vector.shape_cast %29 : vector<1x8x8xf32> to vector<8x8xf32>
    %31 = vector.shape_cast %28 : vector<8x8xf32> to vector<1x8x8xf32>
    tpu.vector_store %arg7[%c2_27, %c0_28, %c0_29], %31 {strides = array<i32>} : memref<4x8x8xf32, #tpu.memory_space<vmem>>, vector<1x8x8xf32>,
    %c3 = arith.constant 3 : index
    %c0_30 = arith.constant 0 : index
    %c0_31 = arith.constant 0 : index
    %32 = vector.load %arg7[%c3, %c0_30, %c0_31] : memref<4x8x8xf32, #tpu.memory_space<vmem>>, vector<1x8x8xf32>
    %33 = vector.shape_cast %32 : vector<1x8x8xf32> to vector<8x8xf32>
    %c3_32 = arith.constant 3 : index
    %c0_33 = arith.constant 0 : index
    %c0_34 = arith.constant 0 : index
    %34 = vector.load %arg5[%c3_32, %c0_33, %c0_34] : memref<4x32x8xbf16, #tpu.memory_space<vmem>>, vector<1x32x8xbf16>
    %35 = vector.shape_cast %34 : vector<1x32x8xbf16> to vector<32x8xbf16>
    %cst_35 = arith.constant dense<0.000000e+00> : vector<8x8xf32>
    %36 = tpu.matmul %4, %35, %cst_35 {dimension_numbers = #tpu.dot_dimension_numbers<[1], [0], [0], [1], [0, 0, 1, 1], [], []>} : vector<8x32xbf16>, vector<32x8xbf16>, vector<8x8xf32> -> vector<8x8xf32>
    %37 = arith.addf %33, %36 : vector<8x8xf32>
    %c3_36 = arith.constant 3 : index
    %c0_37 = arith.constant 0 : index
    %c0_38 = arith.constant 0 : index
    %38 = vector.load %arg7[%c3_36, %c0_37, %c0_38] : memref<4x8x8xf32, #tpu.memory_space<vmem>>, vector<1x8x8xf32>
    %39 = vector.shape_cast %38 : vector<1x8x8xf32> to vector<8x8xf32>
    %40 = vector.shape_cast %37 : vector<8x8xf32> to vector<1x8x8xf32>
    tpu.vector_store %arg7[%c3_36, %c0_37, %c0_38], %40 {strides = array<i32>} : memref<4x8x8xf32, #tpu.memory_space<vmem>>, vector<1x8x8xf32>,
    %c0_i32_39 = arith.constant 0 : i32
    %41 = arith.cmpi eq, %arg3, %c0_i32_39 : i32
    %42 = arith.extui %41 : i1 to i32
    %c0_i32_40 = arith.constant 0 : i32
    %43 = arith.cmpi ne, %42, %c0_i32_40 : i32
    scf.if %43 {
      %c0_41 = arith.constant 0 : index
      %c0_42 = arith.constant 0 : index
      %c0_43 = arith.constant 0 : index
      %44 = vector.load %arg7[%c0_41, %c0_42, %c0_43] : memref<4x8x8xf32, #tpu.memory_space<vmem>>, vector<4x8x8xf32>
      %45 = arith.truncf %44 : vector<4x8x8xf32> to vector<4x8x8xbf16>
      %c0_44 = arith.constant 0 : index
      %c0_45 = arith.constant 0 : index
      %c0_46 = arith.constant 0 : index
      %c0_47 = arith.constant 0 : index
      %46 = vector.load %arg6[%c0_44, %c0_45, %c0_46, %c0_47] : memref<1x4x8x8xbf16, #tpu.memory_space<vmem>>, vector<1x4x8x8xbf16>
      %47 = vector.shape_cast %46 : vector<1x4x8x8xbf16> to vector<4x8x8xbf16>
      %48 = vector.shape_cast %45 : vector<4x8x8xbf16> to vector<1x4x8x8xbf16>
      tpu.vector_store %arg6[%c0_44, %c0_45, %c0_46, %c0_47], %48 {strides = array<i32>} : memref<1x4x8x8xbf16, #tpu.memory_space<vmem>>, vector<1x4x8x8xbf16>,
    } else {
    }
    return
  }
  func.func @transform_0(%arg0: i32, %arg1: i32, %arg2: i32, %arg3: i32) -> (i32, i32, i32) {
    %c0_i32 = arith.constant 0 : i32
    return %arg1, %arg2, %arg3 : i32, i32, i32
  }
  func.func @transform_1(%arg0: i32, %arg1: i32, %arg2: i32, %arg3: i32) -> (i32, i32, i32) {
    %c0_i32 = arith.constant 0 : i32
    %c0_i32_0 = arith.constant 0 : i32
    return %arg0, %arg3, %c0_i32 : i32, i32, i32
  }
  func.func @transform_2(%arg0: i32, %arg1: i32, %arg2: i32, %arg3: i32) -> (i32, i32, i32, i32) {
    %c0_i32 = arith.constant 0 : i32
    %c0_i32_0 = arith.constant 0 : i32
    return %arg1, %arg0, %arg2, %c0_i32 : i32, i32, i32, i32
  }
}

module attributes {stable_mosaic.version = 11 : i64} {
  func.func @_oproj_kernel(%arg0: i32, %arg1: i32, %arg2: i32, %arg3: i32, %arg4: memref<1x2x8x8xbf16, #tpu.memory_space<vmem>>, %arg5: memref<2x8x32xbf16, #tpu.memory_space<vmem>>, %arg6: memref<1x8x32xf32, #tpu.memory_space<vmem>>, %arg7: memref<1x8x32xf32, #tpu.memory_space<vmem>>, %arg8: memref<8x32xf32, #tpu.memory_space<vmem>>) attributes {dimension_semantics = [#tpu.dimension_semantics<parallel>, #tpu.dimension_semantics<parallel>, #tpu.dimension_semantics<parallel>, #tpu.dimension_semantics<arbitrary>], iteration_bounds = array<i64: 2, 1, 1, 1>, scalar_prefetch = 0 : i64, scratch_operands = 1 : i64, tpu.core_type = #tpu.core_type<tc>, window_params = [{transform_indices = @transform_0, window_bounds = array<i64: 1, 2, 8, 8>}, {transform_indices = @transform_1, window_bounds = array<i64: 2, 8, 32>}, {transform_indices = @transform_2, window_bounds = array<i64: 1, 8, 32>}, {transform_indices = @transform_3, window_bounds = array<i64: 1, 8, 32>}]} {
    %c0_i32 = arith.constant 0 : i32
    %0 = arith.cmpi eq, %arg3, %c0_i32 : i32
    %1 = arith.extui %0 : i1 to i32
    %c0_i32_0 = arith.constant 0 : i32
    %2 = arith.cmpi ne, %1, %c0_i32_0 : i32
    scf.if %2 {
      %c0_16 = arith.constant 0 : index
      %c0_17 = arith.constant 0 : index
      %c0_18 = arith.constant 0 : index
      %22 = vector.load %arg6[%c0_16, %c0_17, %c0_18] : memref<1x8x32xf32, #tpu.memory_space<vmem>>, vector<1x8x32xf32>
      %23 = vector.shape_cast %22 : vector<1x8x32xf32> to vector<8x32xf32>
      %c0_19 = arith.constant 0 : index
      %c0_20 = arith.constant 0 : index
      %24 = vector.load %arg8[%c0_19, %c0_20] : memref<8x32xf32, #tpu.memory_space<vmem>>, vector<8x32xf32>
      tpu.vector_store %arg8[%c0_19, %c0_20], %23 {strides = array<i32>} : memref<8x32xf32, #tpu.memory_space<vmem>>, vector<8x32xf32>,
    } else {
    }
    %c0 = arith.constant 0 : index
    %c0_1 = arith.constant 0 : index
    %c0_2 = arith.constant 0 : index
    %c0_3 = arith.constant 0 : index
    %3 = vector.load %arg4[%c0, %c0_1, %c0_2, %c0_3] : memref<1x2x8x8xbf16, #tpu.memory_space<vmem>>, vector<1x2x8x8xbf16>
    %4 = vector.shape_cast %3 : vector<1x2x8x8xbf16> to vector<2x8x8xbf16>
    %c0_4 = arith.constant 0 : index
    %c0_5 = arith.constant 0 : index
    %5 = vector.load %arg8[%c0_4, %c0_5] : memref<8x32xf32, #tpu.memory_space<vmem>>, vector<8x32xf32>
    %6 = vector.extract_strided_slice %4 {offsets = [0, 0, 0], sizes = [1, 8, 8], strides = [1, 1, 1]} : vector<2x8x8xbf16> to vector<1x8x8xbf16>
    %7 = vector.shape_cast %6 : vector<1x8x8xbf16> to vector<8x8xbf16>
    %c0_6 = arith.constant 0 : index
    %c0_7 = arith.constant 0 : index
    %c0_8 = arith.constant 0 : index
    %8 = vector.load %arg5[%c0_6, %c0_7, %c0_8] : memref<2x8x32xbf16, #tpu.memory_space<vmem>>, vector<1x8x32xbf16>
    %9 = vector.shape_cast %8 : vector<1x8x32xbf16> to vector<8x32xbf16>
    %cst = arith.constant dense<0.000000e+00> : vector<8x32xf32>
    %10 = tpu.matmul %7, %9, %cst {dimension_numbers = #tpu.dot_dimension_numbers<[1], [0], [0], [1], [0, 0, 1, 1], [], []>} : vector<8x8xbf16>, vector<8x32xbf16>, vector<8x32xf32> -> vector<8x32xf32>
    %11 = arith.addf %5, %10 : vector<8x32xf32>
    %12 = vector.extract_strided_slice %4 {offsets = [1, 0, 0], sizes = [1, 8, 8], strides = [1, 1, 1]} : vector<2x8x8xbf16> to vector<1x8x8xbf16>
    %13 = vector.shape_cast %12 : vector<1x8x8xbf16> to vector<8x8xbf16>
    %c1 = arith.constant 1 : index
    %c0_9 = arith.constant 0 : index
    %c0_10 = arith.constant 0 : index
    %14 = vector.load %arg5[%c1, %c0_9, %c0_10] : memref<2x8x32xbf16, #tpu.memory_space<vmem>>, vector<1x8x32xbf16>
    %15 = vector.shape_cast %14 : vector<1x8x32xbf16> to vector<8x32xbf16>
    %cst_11 = arith.constant dense<0.000000e+00> : vector<8x32xf32>
    %16 = tpu.matmul %13, %15, %cst_11 {dimension_numbers = #tpu.dot_dimension_numbers<[1], [0], [0], [1], [0, 0, 1, 1], [], []>} : vector<8x8xbf16>, vector<8x32xbf16>, vector<8x32xf32> -> vector<8x32xf32>
    %17 = arith.addf %11, %16 : vector<8x32xf32>
    %c0_12 = arith.constant 0 : index
    %c0_13 = arith.constant 0 : index
    %18 = vector.load %arg8[%c0_12, %c0_13] : memref<8x32xf32, #tpu.memory_space<vmem>>, vector<8x32xf32>
    tpu.vector_store %arg8[%c0_12, %c0_13], %17 {strides = array<i32>} : memref<8x32xf32, #tpu.memory_space<vmem>>, vector<8x32xf32>,
    %c0_i32_14 = arith.constant 0 : i32
    %19 = arith.cmpi eq, %arg3, %c0_i32_14 : i32
    %20 = arith.extui %19 : i1 to i32
    %c0_i32_15 = arith.constant 0 : i32
    %21 = arith.cmpi ne, %20, %c0_i32_15 : i32
    scf.if %21 {
      %c0_16 = arith.constant 0 : index
      %c0_17 = arith.constant 0 : index
      %22 = vector.load %arg8[%c0_16, %c0_17] : memref<8x32xf32, #tpu.memory_space<vmem>>, vector<8x32xf32>
      %c0_18 = arith.constant 0 : index
      %c0_19 = arith.constant 0 : index
      %c0_20 = arith.constant 0 : index
      %23 = vector.load %arg7[%c0_18, %c0_19, %c0_20] : memref<1x8x32xf32, #tpu.memory_space<vmem>>, vector<1x8x32xf32>
      %24 = vector.shape_cast %23 : vector<1x8x32xf32> to vector<8x32xf32>
      %25 = vector.shape_cast %22 : vector<8x32xf32> to vector<1x8x32xf32>
      tpu.vector_store %arg7[%c0_18, %c0_19, %c0_20], %25 {strides = array<i32>} : memref<1x8x32xf32, #tpu.memory_space<vmem>>, vector<1x8x32xf32>,
    } else {
    }
    return
  }
  func.func @transform_0(%arg0: i32, %arg1: i32, %arg2: i32, %arg3: i32) -> (i32, i32, i32, i32) {
    %c0_i32 = arith.constant 0 : i32
    %c0_i32_0 = arith.constant 0 : i32
    return %arg0, %arg3, %arg1, %c0_i32 : i32, i32, i32, i32
  }
  func.func @transform_1(%arg0: i32, %arg1: i32, %arg2: i32, %arg3: i32) -> (i32, i32, i32) {
    %c0_i32 = arith.constant 0 : i32
    %c0_i32_0 = arith.constant 0 : i32
    return %arg3, %c0_i32, %arg2 : i32, i32, i32
  }
  func.func @transform_2(%arg0: i32, %arg1: i32, %arg2: i32, %arg3: i32) -> (i32, i32, i32) {
    %c0_i32 = arith.constant 0 : i32
    return %arg0, %arg1, %arg2 : i32, i32, i32
  }
  func.func @transform_3(%arg0: i32, %arg1: i32, %arg2: i32, %arg3: i32) -> (i32, i32, i32) {
    %c0_i32 = arith.constant 0 : i32
    return %arg0, %arg1, %arg2 : i32, i32, i32
  }
}

module attributes {stable_mosaic.version = 11 : i64} {
  func.func @_flash_kernel(%arg0: i32, %arg1: i32, %arg2: i32, %arg3: i32, %arg4: memref<1x2x8x8xbf16, #tpu.memory_space<vmem>>, %arg5: memref<1x2x8x8xbf16, #tpu.memory_space<vmem>>, %arg6: memref<1x2x8x8xbf16, #tpu.memory_space<vmem>>, %arg7: memref<1x2x8x8xbf16, #tpu.memory_space<vmem>>, %arg8: memref<2x8x1xf32, #tpu.memory_space<vmem>>, %arg9: memref<2x8x1xf32, #tpu.memory_space<vmem>>, %arg10: memref<2x8x8xf32, #tpu.memory_space<vmem>>) attributes {dimension_semantics = [#tpu.dimension_semantics<parallel>, #tpu.dimension_semantics<parallel>, #tpu.dimension_semantics<parallel>, #tpu.dimension_semantics<arbitrary>], iteration_bounds = array<i64: 2, 1, 1, 1>, scalar_prefetch = 0 : i64, scratch_operands = 3 : i64, tpu.core_type = #tpu.core_type<tc>, window_params = [{transform_indices = @transform_0, window_bounds = array<i64: 1, 2, 8, 8>}, {transform_indices = @transform_1, window_bounds = array<i64: 1, 2, 8, 8>}, {transform_indices = @transform_2, window_bounds = array<i64: 1, 2, 8, 8>}, {transform_indices = @transform_3, window_bounds = array<i64: 1, 2, 8, 8>}]} {
    %c0_i32 = arith.constant 0 : i32
    %0 = arith.cmpi eq, %arg3, %c0_i32 : i32
    %1 = arith.extui %0 : i1 to i32
    %c0_i32_0 = arith.constant 0 : i32
    %2 = arith.cmpi ne, %1, %c0_i32_0 : i32
    scf.if %2 {
      %cst_35 = arith.constant 0xFF800000 : f32
      %36 = vector.broadcast %cst_35 : f32 to vector<2x8x1xf32>
      %c0_36 = arith.constant 0 : index
      %c0_37 = arith.constant 0 : index
      %c0_38 = arith.constant 0 : index
      %37 = vector.load %arg8[%c0_36, %c0_37, %c0_38] : memref<2x8x1xf32, #tpu.memory_space<vmem>>, vector<2x8x1xf32>
      tpu.vector_store %arg8[%c0_36, %c0_37, %c0_38], %36 {strides = array<i32>} : memref<2x8x1xf32, #tpu.memory_space<vmem>>, vector<2x8x1xf32>,
      %cst_39 = arith.constant 0.000000e+00 : f32
      %38 = vector.broadcast %cst_39 : f32 to vector<2x8x1xf32>
      %c0_40 = arith.constant 0 : index
      %c0_41 = arith.constant 0 : index
      %c0_42 = arith.constant 0 : index
      %39 = vector.load %arg9[%c0_40, %c0_41, %c0_42] : memref<2x8x1xf32, #tpu.memory_space<vmem>>, vector<2x8x1xf32>
      tpu.vector_store %arg9[%c0_40, %c0_41, %c0_42], %38 {strides = array<i32>} : memref<2x8x1xf32, #tpu.memory_space<vmem>>, vector<2x8x1xf32>,
      %cst_43 = arith.constant 0.000000e+00 : f32
      %40 = vector.broadcast %cst_43 : f32 to vector<2x8x8xf32>
      %c0_44 = arith.constant 0 : index
      %c0_45 = arith.constant 0 : index
      %c0_46 = arith.constant 0 : index
      %41 = vector.load %arg10[%c0_44, %c0_45, %c0_46] : memref<2x8x8xf32, #tpu.memory_space<vmem>>, vector<2x8x8xf32>
      tpu.vector_store %arg10[%c0_44, %c0_45, %c0_46], %40 {strides = array<i32>} : memref<2x8x8xf32, #tpu.memory_space<vmem>>, vector<2x8x8xf32>,
    } else {
    }
    %c0 = arith.constant 0 : index
    %c0_1 = arith.constant 0 : index
    %c0_2 = arith.constant 0 : index
    %c0_3 = arith.constant 0 : index
    %3 = vector.load %arg4[%c0, %c0_1, %c0_2, %c0_3] : memref<1x2x8x8xbf16, #tpu.memory_space<vmem>>, vector<1x2x8x8xbf16>
    %4 = vector.shape_cast %3 : vector<1x2x8x8xbf16> to vector<2x8x8xbf16>
    %c0_4 = arith.constant 0 : index
    %c0_5 = arith.constant 0 : index
    %c0_6 = arith.constant 0 : index
    %c0_7 = arith.constant 0 : index
    %5 = vector.load %arg5[%c0_4, %c0_5, %c0_6, %c0_7] : memref<1x2x8x8xbf16, #tpu.memory_space<vmem>>, vector<1x2x8x8xbf16>
    %6 = vector.shape_cast %5 : vector<1x2x8x8xbf16> to vector<2x8x8xbf16>
    "tpu.trace_start"() <{level = 10 : i32, message = "hqd,hkd->hqk"}> : () -> ()
    %cst = arith.constant dense<0.000000e+00> : vector<2x8x8xf32>
    %7 = tpu.matmul %4, %6, %cst {dimension_numbers = #tpu.dot_dimension_numbers<[2], [2], [1], [1], [0, 0, 0, 1, 1, 1], [0], [0]>} : vector<2x8x8xbf16>, vector<2x8x8xbf16>, vector<2x8x8xf32> -> vector<2x8x8xf32>
    "tpu.trace_stop"() : () -> ()
    %c0_8 = arith.constant 0 : index
    %c0_9 = arith.constant 0 : index
    %c0_10 = arith.constant 0 : index
    %8 = vector.load %arg8[%c0_8, %c0_9, %c0_10] : memref<2x8x1xf32, #tpu.memory_space<vmem>>, vector<2x8x1xf32>
    %cst_11 = arith.constant dense<0xFF800000> : vector<2x8xf32>
    %9 = vector.multi_reduction <maximumf>, %7, %cst_11 [2] : vector<2x8x8xf32> to vector<2x8xf32>
    %10 = vector.shape_cast %9 : vector<2x8xf32> to vector<2x8x1xf32>
    %11 = arith.maximumf %8, %10 : vector<2x8x1xf32>
    %12 = arith.subf %8, %11 : vector<2x8x1xf32>
    %13 = math.exp %12 : vector<2x8x1xf32>
    %14 = vector.broadcast %11 : vector<2x8x1xf32> to vector<2x8x8xf32>
    %15 = arith.subf %7, %14 : vector<2x8x8xf32>
    %16 = math.exp %15 : vector<2x8x8xf32>
    %c0_12 = arith.constant 0 : index
    %c0_13 = arith.constant 0 : index
    %c0_14 = arith.constant 0 : index
    %17 = vector.load %arg9[%c0_12, %c0_13, %c0_14] : memref<2x8x1xf32, #tpu.memory_space<vmem>>, vector<2x8x1xf32>
    %18 = arith.mulf %13, %17 : vector<2x8x1xf32>
    %cst_15 = arith.constant dense<0.000000e+00> : vector<2x8xf32>
    %19 = vector.multi_reduction <add>, %16, %cst_15 [2] : vector<2x8x8xf32> to vector<2x8xf32>
    %20 = vector.shape_cast %19 : vector<2x8xf32> to vector<2x8x1xf32>
    %21 = arith.addf %18, %20 : vector<2x8x1xf32>
    %c0_16 = arith.constant 0 : index
    %c0_17 = arith.constant 0 : index
    %c0_18 = arith.constant 0 : index
    %22 = vector.load %arg9[%c0_16, %c0_17, %c0_18] : memref<2x8x1xf32, #tpu.memory_space<vmem>>, vector<2x8x1xf32>
    tpu.vector_store %arg9[%c0_16, %c0_17, %c0_18], %21 {strides = array<i32>} : memref<2x8x1xf32, #tpu.memory_space<vmem>>, vector<2x8x1xf32>,
    %c0_19 = arith.constant 0 : index
    %c0_20 = arith.constant 0 : index
    %c0_21 = arith.constant 0 : index
    %23 = vector.load %arg10[%c0_19, %c0_20, %c0_21] : memref<2x8x8xf32, #tpu.memory_space<vmem>>, vector<2x8x8xf32>
    %24 = vector.broadcast %13 : vector<2x8x1xf32> to vector<2x8x8xf32>
    %25 = arith.mulf %24, %23 : vector<2x8x8xf32>
    %26 = arith.truncf %16 : vector<2x8x8xf32> to vector<2x8x8xbf16>
    %c0_22 = arith.constant 0 : index
    %c0_23 = arith.constant 0 : index
    %c0_24 = arith.constant 0 : index
    %c0_25 = arith.constant 0 : index
    %27 = vector.load %arg6[%c0_22, %c0_23, %c0_24, %c0_25] : memref<1x2x8x8xbf16, #tpu.memory_space<vmem>>, vector<1x2x8x8xbf16>
    %28 = vector.shape_cast %27 : vector<1x2x8x8xbf16> to vector<2x8x8xbf16>
    "tpu.trace_start"() <{level = 10 : i32, message = "hqk,hkd->hqd"}> : () -> ()
    %cst_26 = arith.constant dense<0.000000e+00> : vector<2x8x8xf32>
    %29 = tpu.matmul %26, %28, %cst_26 {dimension_numbers = #tpu.dot_dimension_numbers<[2], [1], [1], [2], [0, 0, 0, 1, 1, 2], [0], [0]>} : vector<2x8x8xbf16>, vector<2x8x8xbf16>, vector<2x8x8xf32> -> vector<2x8x8xf32>
    "tpu.trace_stop"() : () -> ()
    %30 = arith.addf %25, %29 : vector<2x8x8xf32>
    %c0_27 = arith.constant 0 : index
    %c0_28 = arith.constant 0 : index
    %c0_29 = arith.constant 0 : index
    %31 = vector.load %arg10[%c0_27, %c0_28, %c0_29] : memref<2x8x8xf32, #tpu.memory_space<vmem>>, vector<2x8x8xf32>
    tpu.vector_store %arg10[%c0_27, %c0_28, %c0_29], %30 {strides = array<i32>} : memref<2x8x8xf32, #tpu.memory_space<vmem>>, vector<2x8x8xf32>,
    %c0_30 = arith.constant 0 : index
    %c0_31 = arith.constant 0 : index
    %c0_32 = arith.constant 0 : index
    %32 = vector.load %arg8[%c0_30, %c0_31, %c0_32] : memref<2x8x1xf32, #tpu.memory_space<vmem>>, vector<2x8x1xf32>
    tpu.vector_store %arg8[%c0_30, %c0_31, %c0_32], %11 {strides = array<i32>} : memref<2x8x1xf32, #tpu.memory_space<vmem>>, vector<2x8x1xf32>,
    %c0_i32_33 = arith.constant 0 : i32
    %33 = arith.cmpi eq, %arg3, %c0_i32_33 : i32
    %34 = arith.extui %33 : i1 to i32
    %c0_i32_34 = arith.constant 0 : i32
    %35 = arith.cmpi ne, %34, %c0_i32_34 : i32
    scf.if %35 {
      %c0_35 = arith.constant 0 : index
      %c0_36 = arith.constant 0 : index
      %c0_37 = arith.constant 0 : index
      %36 = vector.load %arg10[%c0_35, %c0_36, %c0_37] : memref<2x8x8xf32, #tpu.memory_space<vmem>>, vector<2x8x8xf32>
      %c0_38 = arith.constant 0 : index
      %c0_39 = arith.constant 0 : index
      %c0_40 = arith.constant 0 : index
      %37 = vector.load %arg9[%c0_38, %c0_39, %c0_40] : memref<2x8x1xf32, #tpu.memory_space<vmem>>, vector<2x8x1xf32>
      %38 = tpu.reciprocal %37 {approx = true} : vector<2x8x1xf32> -> vector<2x8x1xf32>
      %39 = vector.broadcast %38 : vector<2x8x1xf32> to vector<2x8x8xf32>
      %40 = arith.mulf %36, %39 : vector<2x8x8xf32>
      %41 = arith.truncf %40 : vector<2x8x8xf32> to vector<2x8x8xbf16>
      %c0_41 = arith.constant 0 : index
      %c0_42 = arith.constant 0 : index
      %c0_43 = arith.constant 0 : index
      %c0_44 = arith.constant 0 : index
      %42 = vector.load %arg7[%c0_41, %c0_42, %c0_43, %c0_44] : memref<1x2x8x8xbf16, #tpu.memory_space<vmem>>, vector<1x2x8x8xbf16>
      %43 = vector.shape_cast %42 : vector<1x2x8x8xbf16> to vector<2x8x8xbf16>
      %44 = vector.shape_cast %41 : vector<2x8x8xbf16> to vector<1x2x8x8xbf16>
      tpu.vector_store %arg7[%c0_41, %c0_42, %c0_43, %c0_44], %44 {strides = array<i32>} : memref<1x2x8x8xbf16, #tpu.memory_space<vmem>>, vector<1x2x8x8xbf16>,
    } else {
    }
    return
  }
  func.func @transform_0(%arg0: i32, %arg1: i32, %arg2: i32, %arg3: i32) -> (i32, i32, i32, i32) {
    %c0_i32 = arith.constant 0 : i32
    %0 = arith.addi %c0_i32, %arg1 : i32
    %c0_i32_0 = arith.constant 0 : i32
    %c0_i32_1 = arith.constant 0 : i32
    return %arg0, %0, %arg2, %c0_i32_0 : i32, i32, i32, i32
  }
  func.func @transform_1(%arg0: i32, %arg1: i32, %arg2: i32, %arg3: i32) -> (i32, i32, i32, i32) {
    %c0_i32 = arith.constant 0 : i32
    %0 = arith.addi %c0_i32, %arg1 : i32
    %c0_i32_0 = arith.constant 0 : i32
    %c0_i32_1 = arith.constant 0 : i32
    return %arg0, %0, %arg3, %c0_i32_0 : i32, i32, i32, i32
  }
  func.func @transform_2(%arg0: i32, %arg1: i32, %arg2: i32, %arg3: i32) -> (i32, i32, i32, i32) {
    %c1_i32 = arith.constant 1 : i32
    %0 = arith.addi %c1_i32, %arg1 : i32
    %c0_i32 = arith.constant 0 : i32
    %c0_i32_0 = arith.constant 0 : i32
    return %arg0, %0, %arg3, %c0_i32 : i32, i32, i32, i32
  }
  func.func @transform_3(%arg0: i32, %arg1: i32, %arg2: i32, %arg3: i32) -> (i32, i32, i32, i32) {
    %c0_i32 = arith.constant 0 : i32
    %c0_i32_0 = arith.constant 0 : i32
    return %arg0, %arg1, %arg2, %c0_i32 : i32, i32, i32, i32
  }
}

</mosaic_0001>

<bundles_post_ra>
// kernel: hybrid_attention_forward.7
= control target key start
LH: loop header
LB: loop body
LE: loop exit
PB: predicated region body
PF: predicated region fallthrough
CT: control target
= control target key end

     0   :  { %s971_s9 = smov 0   ;;  %s973_s10 = smov 0   ;;  %s1082_s0 = inlined_call_operand.vmem [shape: bf16[2,8,32], index: 0, kind: input, shape index: {}]   ;;  %s1083_s1 = inlined_call_operand.vmem [shape: bf16[6,32,8], index: 1, kind: input, shape index: {}]   ;;  %s1084_s2 = inlined_call_operand.vmem [shape: bf16[2,6,8,8], index: 2, kind: output, shape index: {}]  }
   0x1   :  { %s975_s11 = smov 0  }
   0x2 LB: > { %s34_s12 = sadd.s32 1, %s948_s10  ;;  %p782_p0 = scmp.ge.s32.totalorder %s952_s11, 1  ;;  %s952_s11 = sphi %s975_s11, %s12_s11   ;;  %s948_s10 = sphi %s973_s10, %s1086_s10   ;;  %s944_s9 = sphi %s971_s9, %s1085_s9  }
   0x3   : > { %p36_p1 = scmp.ge.s32.totalorder %s34_s12, 2  ;;  %p170_p2 = scmp.lt.s32.totalorder %s952_s11, 3 }
   0x5   : > { %s1088_s12 = smov (%p36_p1, %s34_s12), 0  ;;  %p171_p3 = pnand %p782_p0, %p170_p2 }
   0x6   : > { %v918_v0 = vld [vmem:[%s1083_s1] sm:$0xff] (!%p171_p3)   ;;  %v954_v1 = vmov (!%p171_p3), 0.0   ;;  %v919_v2 = vld [vmem:[%s1083_s1 + $0x10] sm:$0xff] (!%p171_p3)   ;;  %v920_v3 = vld [vmem:[%s1083_s1 + $0x8] sm:$0xff] (!%p171_p3)   ;;  %vm955_vm0 = vmmov (!%p171_p3), 0   ;;  %p214_p4 = scmp.lt.s32.totalorder (!%p171_p3), %s944_s9, 1 }
   0x7   : > { %174 = sbr.rel (%p171_p3) target bundleno = 259 (0x103), region = 28  ;;  %843 = vmatprep.subr.bf16.mxu0 (!%p171_p3), %v954_v1  ;;  %851 = vmatprep.subr.bf16.mxu1 (!%p171_p3), %v954_v1  ;;  %v921_v4 = vld [vmem:[%s1083_s1 + $0x18] sm:$0xff] (!%p171_p3)   ;;  %vm279_vm1 = vcmask (!%p171_p3), 261120   ;;  %vm254_vm2 = vcmask (!%p171_p3), 64512   ;;  %v922_v5 = vld [vmem:[%s1083_s1 + $0x20] sm:$0xff] (!%p171_p3)   ;;  %v923_v6 = vld [vmem:[%s1083_s1 + $0x30] sm:$0xff] (!%p171_p3)  }
   0x8   : > { %844 = vmatpush3.bf16.msra.mxu0 (!%p171_p3), %v918_v0  ;;  %847 = vmatprep.mubr.msk.bf16.mxu0 (!%p171_p3), %vm955_vm0, %v954_v1  ;;  %255 = vst.msk [vmem:[#allocation2] sm:$0xff] (!%p171_p3), %vm254_vm2, %v954_v1  ;;  %256 = vst.msk [vmem:[#allocation2 + $0x8] sm:$0xff] (!%p171_p3), %vm254_vm2, %v954_v1  ;;  %v924_v8 = vld [vmem:[%s1083_s1 + $0x28] sm:$0xff] (!%p171_p3)   ;;  %v925_v9 = vld [vmem:[%s1083_s1 + $0x38] sm:$0xff] (!%p171_p3)   ;;  %vm646_vm3 = vcmask (!%p171_p3), 60416  }
   0x9   : > { %852 = vmatpush3.bf16.msra.mxu1 (!%p171_p3), %v919_v2  ;;  %845 = vmatprep.subr.bf16.mxu0 (!%p171_p3), %v954_v1  ;;  %257 = vst.msk [vmem:[#allocation2 + $0x10] sm:$0xff] (!%p171_p3), %vm254_vm2, %v954_v1  ;;  %258 = vst.msk [vmem:[#allocation2 + $0x18] sm:$0xff] (!%p171_p3), %vm254_vm2, %v954_v1  ;;  %v926_v10 = vld [vmem:[%s1083_s1 + $0x40] sm:$0xff] (!%p171_p3)   ;;  %v927_v11 = vld [vmem:[%s1083_s1 + $0x50] sm:$0xff] (!%p171_p3)  }
   0xa   : > { %853 = vmatprep.subr.bf16.mxu1 (!%p171_p3), %v954_v1  ;;  %855 = vmatprep.mubr.msk.bf16.mxu1 (!%p171_p3), %vm955_vm0, %v954_v1  ;;  %259 = vst.msk [vmem:[#allocation2 + $0x20] sm:$0xff] (!%p171_p3), %vm254_vm2, %v954_v1  ;;  %260 = vst.msk [vmem:[#allocation2 + $0x28] sm:$0xff] (!%p171_p3), %vm254_vm2, %v954_v1  ;;  %v928_v12 = vld [vmem:[%s1083_s1 + $0x48] sm:$0xff] (!%p171_p3)   ;;  %v929_v13 = vld [vmem:[%s1083_s1 + $0x58] sm:$0xff] (!%p171_p3)  }
   0xc   : > { %846 = vmatpush3.bf16.msra.mxu0 (!%p171_p3), %v920_v3 }
   0xd   : > { %854 = vmatpush3.bf16.msra.mxu1 (!%p171_p3), %v921_v4  ;;  %859 = vmatprep.subr.bf16.mxu0 (!%p171_p3), %v954_v1 }
   0xe   : > { %s1090_s9 = smov (!%p214_p4, %s944_s9), 1  ;;  %867 = vmatprep.subr.bf16.mxu1 %v954_v1 }
   0xf   : > { %s783_s21 = sshll.u32 %s1090_s9, 2  ;;  %v262_v14 = vld [vmem:[#allocation2] sm:$0xff]  ;;  %v327_v15 = vld [vmem:[#allocation2 + $0x8] sm:$0xff]  ;;  %s891_s17 = smul.u32 24, %s1090_s9 }
  0x10   : > { %s223_s26 = scalar_lea.vmem %s1082_s0, %s783_s21  ;;  %v388_v26 = vld [vmem:[#allocation2 + $0x10] sm:$0xff]  ;;  %v449_v27 = vld [vmem:[#allocation2 + $0x18] sm:$0xff] }
  0x11   : > { %v261_v7 = vld [vmem:[%s223_s26] sm:$0xf]  ;;  %s1055_s20 = scalar_lea.vmem %s1084_s2, %s891_s17  ;;  %v571_v43 = vld [vmem:[#allocation2 + $0x28] sm:$0xff] }
  0x12   : > { %848 = vmatmul.mubr.msk.bf16.vlgmr.msra.gmra.mrb[0].mxu0 %vm279_vm1, %v261_v7  ;;  %856 = vmatmul.mubr.msk.bf16.vlgmr.msra.gmra.mrb[0].mxu1 %vm279_vm1, %v261_v7  ;;  %v510_v42 = vld [vmem:[#allocation2 + $0x20] sm:$0xff] }
  0x13   : > { %860 = vmatpush3.bf16.msra.mxu0 %v922_v5  ;;  %868 = vmatpush3.bf16.msra.mxu1 %v923_v6 }
  0x14   : > { %861 = vmatprep.subr.bf16.mxu0 %v954_v1  ;;  %869 = vmatprep.subr.bf16.mxu1 %v954_v1 }
  0x15   : > { %863 = vmatprep.mubr.msk.bf16.mxu0 %vm955_vm0, %v954_v1  ;;  %871 = vmatprep.mubr.msk.bf16.mxu1 %vm955_vm0, %v954_v1 }
  0x17   : > { %862 = vmatpush3.bf16.msra.mxu0 %v924_v8  ;;  %870 = vmatpush3.bf16.msra.mxu1 %v925_v9 }
  0x18   : > { %875 = vmatprep.subr.bf16.mxu0 %v954_v1  ;;  %883 = vmatprep.subr.bf16.mxu1 %v954_v1 }
  0x1a   : > { %864 = vmatmul.mubr.msk.bf16.vlgmr.msra.gmra.mrb[4].mxu0 %vm279_vm1, %v261_v7  ;;  %872 = vmatmul.mubr.msk.bf16.vlgmr.msra.gmra.mrb[4].mxu1 %vm279_vm1, %v261_v7 }
  0x1b   : > { %876 = vmatpush3.bf16.msra.mxu0 %v926_v10  ;;  %884 = vmatpush3.bf16.msra.mxu1 %v927_v11 }
  0x1c   : > { %877 = vmatprep.subr.bf16.mxu0 %v954_v1  ;;  %885 = vmatprep.subr.bf16.mxu1 %v954_v1 }
  0x1d   : > { %879 = vmatprep.mubr.msk.bf16.mxu0 %vm955_vm0, %v954_v1  ;;  %887 = vmatprep.mubr.msk.bf16.mxu1 %vm955_vm0, %v954_v1 }
  0x1f   : > { %878 = vmatpush3.bf16.msra.mxu0 %v928_v12  ;;  %886 = vmatpush3.bf16.msra.mxu1 %v929_v13 }
  0x22   : > { %880 = vmatmul.mubr.msk.bf16.vlgmr.msra.gmra.mrb[8].mxu0 %vm279_vm1, %v261_v7  ;;  %888 = vmatmul.mubr.msk.bf16.vlgmr.msra.gmra.mrb[8].mxu1 %vm279_vm1, %v261_v7 }
  0xe5   : > { %v317_v16 = vpop.f32.mrb[0].mxu0  ;;  %v379_v18 = vpop.f32.mrb[0].mxu1 }
  0xe6   : > { %v323_v17 = vadd.f32 %v317_v16, %v262_v14  ;;  %v849_v19 = vpop.f32.mrb[1].mxu0  ;;  %v385_v20 = vadd.f32 %v379_v18, %v327_v15  ;;  %v857_v21 = vpop.f32.mrb[1].mxu1 }
  0xe7   : > { %v320_v22 = vpop.f32.mrb[2].mxu0  ;;  %v382_v23 = vpop.f32.mrb[2].mxu1 }
  0xe8   : > { %325 = vst.msk [vmem:[#allocation2] sm:$0xff] %vm254_vm2, %v323_v17  ;;  %v850_v24 = vpop.f32.mrb[3].mxu0  ;;  %386 = vst.msk [vmem:[#allocation2 + $0x8] sm:$0xff] %vm254_vm2, %v385_v20  ;;  %v858_v25 = vpop.f32.mrb[3].mxu1 }
  0xed   : > { %v440_v28 = vpop.f32.mrb[4].mxu0  ;;  %v501_v30 = vpop.f32.mrb[4].mxu1 }
  0xee   : > { %v446_v29 = vadd.f32 %v440_v28, %v388_v26  ;;  %v865_v31 = vpop.f32.mrb[5].mxu0  ;;  %v507_v33 = vadd.f32 %v501_v30, %v449_v27  ;;  %v873_v34 = vpop.f32.mrb[5].mxu1 }
  0xef   : > { %v634_v32 = vld [vmem:[#allocation2] sm:$0xff]  ;;  %v443_v35 = vpop.f32.mrb[6].mxu0  ;;  %v635_v37 = vld [vmem:[#allocation2 + $0x8] sm:$0xff]  ;;  %v504_v38 = vpop.f32.mrb[6].mxu1 }
  0xf0   : > { %v640_v36 = vpack.c.bf16 %v634_v32, %v634_v32  ;;  %447 = vst.msk [vmem:[#allocation2 + $0x10] sm:$0xff] %vm254_vm2, %v446_v29  ;;  %v866_v39 = vpop.f32.mrb[7].mxu0  ;;  %v641_v40 = vpack.c.bf16 %v635_v37, %v635_v37  ;;  %508 = vst.msk [vmem:[#allocation2 + $0x18] sm:$0xff] %vm254_vm2, %v507_v33  ;;  %v874_v41 = vpop.f32.mrb[7].mxu1 }
  0xf2   : > { %647 = vst.msk [vmem:[%s1055_s20] sm:$0xf] %vm646_vm3, %v640_v36  ;;  %648 = vst.msk [vmem:[%s1055_s20 + $0x4] sm:$0xf] %vm646_vm3, %v641_v40 }
  0xf5   : > { %v562_v44 = vpop.f32.mrb[8].mxu0  ;;  %v623_v46 = vpop.f32.mrb[8].mxu1 }
  0xf6   : > { %v568_v45 = vadd.f32 %v562_v44, %v510_v42  ;;  %v881_v47 = vpop.f32.mrb[9].mxu0  ;;  %v629_v49 = vadd.f32 %v623_v46, %v571_v43  ;;  %v889_v50 = vpop.f32.mrb[9].mxu1 }
  0xf7   : > { %v636_v48 = vld [vmem:[#allocation2 + $0x10] sm:$0xff]  ;;  %v565_v51 = vpop.f32.mrb[10].mxu0  ;;  %v637_v53 = vld [vmem:[#allocation2 + $0x18] sm:$0xff]  ;;  %v626_v54 = vpop.f32.mrb[10].mxu1 }
  0xf8   : > { %v642_v52 = vpack.c.bf16 %v636_v48, %v636_v48  ;;  %569 = vst.msk [vmem:[#allocation2 + $0x20] sm:$0xff] %vm254_vm2, %v568_v45  ;;  %v882_v55 = vpop.f32.mrb[11].mxu0  ;;  %v643_v56 = vpack.c.bf16 %v637_v53, %v637_v53  ;;  %630 = vst.msk [vmem:[#allocation2 + $0x28] sm:$0xff] %vm254_vm2, %v629_v49  ;;  %v890_v57 = vpop.f32.mrb[11].mxu1 }
  0xfa   : > { %649 = vst.msk [vmem:[%s1055_s20 + $0x8] sm:$0xf] %vm646_vm3, %v642_v52  ;;  %650 = vst.msk [vmem:[%s1055_s20 + $0xc] sm:$0xf] %vm646_vm3, %v643_v56 }
  0xff   : > { %v638_v58 = vld [vmem:[#allocation2 + $0x20] sm:$0xff]  ;;  %v639_v60 = vld [vmem:[#allocation2 + $0x28] sm:$0xff] }
 0x100   : > { %v644_v59 = vpack.c.bf16 %v638_v58, %v638_v58  ;;  %v645_v61 = vpack.c.bf16 %v639_v60, %v639_v60 }
 0x102   : > { %651 = vst.msk [vmem:[%s1055_s20 + $0x10] sm:$0xf] %vm646_vm3, %v644_v59  ;;  %652 = vst.msk [vmem:[%s1055_s20 + $0x14] sm:$0xf] %vm646_vm3, %v645_v61 }
 0x103 PF: > { %s12_s11 = sadd.s32 1, %s952_s11   ;;  %s1085_s9 = smov %s948_s10 }
 0x104   : > { %p9_p5 = scmp.ge.s32.totalorder %s12_s11, 4   ;;  %s1086_s10 = smov %s1088_s12 }
 0x106   :  { %11 = sbr.rel (!%p9_p5) target bundleno = 2 (0x2), region = 79 }

// kernel: hybrid_attention_forward.8
= control target key start
LH: loop header
LB: loop body
LE: loop exit
PB: predicated region body
PF: predicated region fallthrough
CT: control target
= control target key end

     0   :  { %s945_s12 = smov 0   ;;  %s947_s13 = smov 0   ;;  %s1019_s0 = inlined_call_operand.vmem [shape: bf16[2,6,8,8], index: 0, kind: input, shape index: {}, may-alias: {0,1,2}]   ;;  %s1020_s1 = inlined_call_operand.vmem [shape: bf16[2,6,8,8], index: 1, kind: input, shape index: {}, may-alias: {0,1,2}]   ;;  %s1021_s2 = inlined_call_operand.vmem [shape: bf16[2,6,8,8], index: 2, kind: input, shape index: {}, may-alias: {0,1,2}]   ;;  %s1022_s3 = inlined_call_operand.vmem [shape: bf16[2,2,8,8], index: 3, kind: output, shape index: {}]  }
   0x1   :  { %s949_s14 = smov 0  }
   0x2 LB: > { %s39_s15 = sadd.s32 1, %s915_s13  ;;  %p803_p0 = scmp.ge.s32.totalorder %s919_s14, 1  ;;  %s919_s14 = sphi %s949_s14, %s13_s14   ;;  %s915_s13 = sphi %s947_s13, %s1024_s13   ;;  %s911_s12 = sphi %s945_s12, %s1023_s12  }
   0x3   : > { %p41_p1 = scmp.ge.s32.totalorder %s39_s15, 2  ;;  %p231_p2 = scmp.lt.s32.totalorder %s919_s14, 3 }
   0x5   : > { %s1026_s15 = smov (%p41_p1, %s39_s15), 0  ;;  %p232_p3 = pnand %p803_p0, %p231_p2 }
   0x6   : > { %p296_p4 = scmp.lt.s32.totalorder (!%p232_p3), %s911_s12, 1  ;;  %vm361_vm0 = vcmask (!%p232_p3), 64512   ;;  %v921_v0 = vmov (!%p232_p3), 0.0   ;;  %vm922_vm1 = vmmov (!%p232_p3), 0   ;;  %vm356_vm2 = vcmask (!%p232_p3), 7168  }
   0x7   : > { %235 = sbr.rel (%p232_p3) target bundleno = 829 (0x33d), region = 32  ;;  %828 = vmatprep.subr.bf16.mxu0 (!%p232_p3), %v921_v0  ;;  %362 = vst.msk [vmem:[#allocation4] sm:$0xff] (!%p232_p3), %vm361_vm0, %v921_v0  ;;  %363 = vst.msk [vmem:[#allocation4 + $0x8] sm:$0xff] (!%p232_p3), %vm361_vm0, %v921_v0  ;;  %834 = vmatprep.subr.bf16.mxu1 (!%p232_p3), %v921_v0  ;;  %v923_v7 = vmov (!%p232_p3), -inf   ;;  %v924_v18 = vmov (!%p232_p3), 0   ;;  %vm529_vm3 = vcmask (!%p232_p3), 1043456  }
   0x8   : > { %830 = vmatprep.mubr.msk.bf16.mxu0 (!%p232_p3), %vm922_vm1, %v921_v0  ;;  %836 = vmatprep.mubr.msk.bf16.mxu1 (!%p232_p3), %vm922_vm1, %v921_v0  ;;  %357 = vst.msk [vmem:[#allocation2] sm:$0xff] (!%p232_p3), %vm356_vm2, %v923_v7  ;;  %358 = vst.msk [vmem:[#allocation2 + $0x8] sm:$0xff] (!%p232_p3), %vm356_vm2, %v923_v7  ;;  %vm648_vm4 = vcmask (!%p232_p3), 60416  }
   0x9   : > { %359 = vst.msk [vmem:[#allocation3] sm:$0xff] (!%p232_p3), %vm356_vm2, %v921_v0  ;;  %360 = vst.msk [vmem:[#allocation3 + $0x8] sm:$0xff] (!%p232_p3), %vm356_vm2, %v921_v0  ;;  %883 = vset.pattern.permute.xlu1 (!%p232_p3), %v924_v18  ;;  %884 = vset.pattern.permute.xlu0 (!%p232_p3), %v924_v18 }
   0xe   : > { %s1028_s12 = smov (!%p296_p4, %s911_s12), 1  ;;  %v508_v59 = vld [vmem:[#allocation4] sm:$0xff]  ;;  %v509_v62 = vld [vmem:[#allocation4 + $0x8] sm:$0xff] }
   0xf   : > { %s970_s16 = smul.u32 24, %s1028_s12  ;;  %v461_v19 = vld [vmem:[#allocation2] sm:$0xff]  ;;  %v462_v22 = vld [vmem:[#allocation2 + $0x8] sm:$0xff]  ;;  %s819_s28 = sshll.u32 %s1028_s12, 3 }
  0x10   : > { %v493_v47 = vld [vmem:[#allocation3] sm:$0xff]  ;;  %v494_v50 = vld [vmem:[#allocation3 + $0x8] sm:$0xff]  ;;  %s349_s4 = scalar_lea.vmem %s1022_s3, %s819_s28 }
  0x11   : > { %s816_s17 = sadd.s32 8, %s970_s16  ;;  %s306_s23 = scalar_lea.vmem %s1019_s0, %s970_s16 }
  0x12   : > { %s320_s20 = scalar_lea.vmem %s1020_s1, %s816_s17  ;;  %v364_v5 = vld [vmem:[%s306_s23] sm:$0xf]  ;;  %v365_v6 = vld [vmem:[%s306_s23 + $0x4] sm:$0xf]  ;;  %s818_s24 = sadd.s32 16, %s970_s16 }
  0x13   : > { %v366_v1 = vld [vmem:[%s320_s20] sm:$0xf]  ;;  %v367_v2 = vld [vmem:[%s320_s20 + $0x4] sm:$0xf]  ;;  %s335_s27 = scalar_lea.vmem %s1021_s2, %s818_s24 }
  0x14   : > { %v373_v3 = vsel %vm361_vm0, %v366_v1, 0  ;;  %v419_v4 = vsel %vm361_vm0, %v367_v2, 0  ;;  %v524_v27 = vld [vmem:[%s335_s27] sm:$0xf]  ;;  %v525_v29 = vld [vmem:[%s335_s27 + $0x4] sm:$0xf] }
  0x15   : > { %829 = vmatpush3.bf16.xpose.msra.mxu0 %v373_v3  ;;  %835 = vmatpush3.bf16.xpose.msra.mxu1 %v419_v4  ;;  %v531_v28 = vsel %vm529_vm3, %v524_v27, 0  ;;  %v577_v30 = vsel %vm529_vm3, %v525_v29, 0 }
  0x16   : > { %840 = vmatprep.subr.bf16.mxu0 %v921_v0  ;;  %846 = vmatprep.subr.bf16.mxu1 %v921_v0 }
  0x1c   : > { %831 = vmatmul.mubr.msk.bf16.vlgmr.msra.gmra.mrb[0].mxu0 %vm361_vm0, %v364_v5  ;;  %837 = vmatmul.mubr.msk.bf16.vlgmr.msra.gmra.mrb[0].mxu1 %vm361_vm0, %v365_v6 }
  0x1d   : > { %842 = vmatprep.mubr.msk.bf16.mxu0 %vm922_vm1, %v921_v0  ;;  %848 = vmatprep.mubr.msk.bf16.mxu1 %vm922_vm1, %v921_v0 }
  0x1e   : > { %841 = vmatpush3.bf16.msra.mxu0 %v531_v28  ;;  %847 = vmatpush3.bf16.msra.mxu1 %v577_v30 }
  0xef   : > { %v409_v8 = vpop.f32.mrb[0].mxu0  ;;  %v455_v9 = vpop.f32.mrb[0].mxu1 }
  0xf0   : > { %v832_v10 = vpop.f32.mrb[1].mxu0  ;;  %v838_v11 = vpop.f32.mrb[1].mxu1  ;;  %v463_v12 = vsel %vm361_vm0, %v409_v8, -inf  ;;  %v466_v17 = vsel %vm361_vm0, %v455_v9, -inf }
  0xf1   : > { %464 = vmax.xlane.f32.xlu0 %v463_v12  ;;  %v412_v13 = vpop.f32.mrb[2].mxu0  ;;  %v458_v14 = vpop.f32.mrb[2].mxu1 }
  0xf2   : > { %v833_v15 = vpop.f32.mrb[3].mxu0  ;;  %v839_v16 = vpop.f32.mrb[3].mxu1 }
  0xf5   : > { %467 = vmax.xlane.f32.xlu0 %v466_v17 }
 0x17e   : > { %v465_v20 = vpop.xlane.xlu0 %464 }
 0x17f   : > { %v469_v21 = vmax.f32 %v461_v19, %v465_v20 }
 0x181   : > { %v471_v23 = vsub.f32 %v461_v19, %v469_v21  ;;  %623 = vst.msk [vmem:[#allocation2] sm:$0xff] %vm356_vm2, %v469_v21  ;;  %479 = vperm.xlu1 %883, %v469_v21  }
 0x182   : > { %v468_v24 = vpop.xlane.xlu0 %467 }
 0x183   : > { %v470_v25 = vmax.f32 %v462_v22, %v468_v24  ;;  %v473_v44 = vmul.f32 1.442695, %v471_v23 }
 0x185   : > { %v472_v26 = vsub.f32 %v462_v22, %v470_v25  ;;  %624 = vst.msk [vmem:[#allocation2 + $0x8] sm:$0xff] %vm356_vm2, %v470_v25  ;;  %484 = vperm.xlu1 %883, %v470_v25  }
 0x187   : > { %v475_v43 = vmul.f32 1.442695, %v472_v26 }
 0x200   : > { %v480_v31 = vpop.permute.xlu1 %479 }
 0x201   : > { %v487_v32 = vsub.f32 %v409_v8, %v480_v31 }
 0x203   : > { %v489_v33 = vmul.f32 1.442695, %v487_v32 }
 0x204   : > { %v485_v34 = vpop.permute.xlu1 %484 }
 0x205   : > { %885 = vpow2.f32 %v489_v33  ;;  %v488_v35 = vsub.f32 %v455_v9, %v485_v34 }
 0x207   : > { %v491_v36 = vmul.f32 1.442695, %v488_v35 }
 0x209   : > { %887 = vpow2.f32 %v491_v36 }
 0x20a   : > { %889 = vpow2.f32 %v475_v43 }
 0x20b   : > { %891 = vpow2.f32 %v473_v44 }
 0x20f   : > { %v886_v37 = vpop.eup %885 }
 0x210   : > { %v497_v38 = vsel %vm361_vm0, %v886_v37, 0.0  ;;  %v522_v39 = vpack.c.bf16 %v886_v37, %v886_v37 }
 0x211   : > { %498 = vadd.xlane.f32.xlu0 %v497_v38 }
 0x212   : > { %843 = vmatmul.mubr.msk.bf16.vlgmr.msra.gmra.mrb[4].mxu0 %vm361_vm0, %v522_v39 }
 0x213   : > { %v888_v40 = vpop.eup %887 }
 0x214   : > { %v500_v41 = vsel %vm361_vm0, %v888_v40, 0.0  ;;  %v523_v42 = vpack.c.bf16 %v888_v40, %v888_v40  ;;  %v890_v45 = vpop.eup %889 }
 0x215   : > { %501 = vadd.xlane.f32.xlu1 %v500_v41  ;;  %v892_v46 = vpop.eup %891  ;;  %v496_v52 = vmul.f32 %v890_v45, %v494_v50 }
 0x216   : > { %849 = vmatmul.mubr.msk.bf16.vlgmr.msra.gmra.mrb[4].mxu1 %vm361_vm0, %v523_v42  ;;  %v495_v48 = vmul.f32 %v892_v46, %v493_v47 }
 0x226   : > { %517 = vperm.xlu1 %883, %v890_v45  }
 0x227   : > { %512 = vperm.xlu0 %884, %v892_v46  }
 0x29e   : > { %v499_v49 = vpop.xlane.xlu0 %498 }
 0x29f   : > { %v503_v51 = vadd.f32 %v499_v49, %v495_v48 }
 0x2a1   : > { %506 = vst.msk [vmem:[#allocation3] sm:$0xff] %vm356_vm2, %v503_v51 }
 0x2a2   : > { %v502_v53 = vpop.xlane.xlu1 %501 }
 0x2a3   : > { %v504_v54 = vadd.f32 %v502_v53, %v496_v52 }
 0x2a5   : > { %507 = vst.msk [vmem:[#allocation3 + $0x8] sm:$0xff] %vm356_vm2, %v504_v54 }
 0x2a6   : > { %v513_v60 = vpop.permute.xlu0 %512  ;;  %v518_v63 = vpop.permute.xlu1 %517 }
 0x2a7   : > { %v520_v61 = vmul.f32 %v513_v60, %v508_v59  ;;  %v521_v4 = vmul.f32 %v518_v63, %v509_v62 }
 0x2a8   : > { %v630_v55 = vld [vmem:[#allocation3] sm:$0xff] }
 0x2a9   : > { %893 = vrcp.f32 %v630_v55 }
 0x2ac   : > { %v631_v56 = vld [vmem:[#allocation3 + $0x8] sm:$0xff] }
 0x2ad   : > { %895 = vrcp.f32 %v631_v56 }
 0x2b3   : > { %v894_v57 = vpop.eup %893 }
 0x2b4   : > { %636 = vperm.xlu0 %884, %v894_v57  }
 0x2b7   : > { %v896_v58 = vpop.eup %895 }
 0x2b8   : > { %641 = vperm.xlu0 %884, %v896_v58  }
 0x2e5   : > { %v567_v0 = vpop.f32.mrb[4].mxu0 }
 0x2e6   : > { %v619_v1 = vadd.f32 %v567_v0, %v520_v61  ;;  %v844_v2 = vpop.f32.mrb[5].mxu0 }
 0x2e7   : > { %v570_v3 = vpop.f32.mrb[6].mxu0 }
 0x2e8   : > { %621 = vst.msk [vmem:[#allocation4] sm:$0xff] %vm361_vm0, %v619_v1  ;;  %v845_v5 = vpop.f32.mrb[7].mxu0 }
 0x2e9   : > { %v613_v6 = vpop.f32.mrb[4].mxu1 }
 0x2ea   : > { %v620_v7 = vadd.f32 %v613_v6, %v521_v4  ;;  %v850_v8 = vpop.f32.mrb[5].mxu1 }
 0x2eb   : > { %v616_v9 = vpop.f32.mrb[6].mxu1 }
 0x2ec   : > { %622 = vst.msk [vmem:[#allocation4 + $0x8] sm:$0xff] %vm361_vm0, %v620_v7  ;;  %v851_v10 = vpop.f32.mrb[7].mxu1 }
 0x2ef   : > { %v628_v12 = vld [vmem:[#allocation4] sm:$0xff] }
 0x2f3   : > { %v629_v15 = vld [vmem:[#allocation4 + $0x8] sm:$0xff] }
 0x333   : > { %v637_v11 = vpop.permute.xlu0 %636 }
 0x334   : > { %v644_v13 = vmul.f32 %v637_v11, %v628_v12 }
 0x336   : > { %v646_v14 = vpack.c.bf16 %v644_v13, %v644_v13 }
 0x337   : > { %v642_v16 = vpop.permute.xlu0 %641 }
 0x338   : > { %649 = vst.msk [vmem:[%s349_s4] sm:$0xf] %vm648_vm4, %v646_v14  ;;  %v645_v17 = vmul.f32 %v642_v16, %v629_v15 }
 0x33a   : > { %v647_v18 = vpack.c.bf16 %v645_v17, %v645_v17 }
 0x33c   : > { %650 = vst.msk [vmem:[%s349_s4 + $0x4] sm:$0xf] %vm648_vm4, %v647_v18 }
 0x33d PF: > { %s13_s14 = sadd.s32 1, %s919_s14   ;;  %s1023_s12 = smov %s915_s13 }
 0x33e   : > { %p10_p5 = scmp.ge.s32.totalorder %s13_s14, 4   ;;  %s1024_s13 = smov %s1026_s15 }
 0x340   :  { %12 = sbr.rel (!%p10_p5) target bundleno = 2 (0x2), region = 76 }

// kernel: hybrid_attention_forward.9
= control target key start
LH: loop header
LB: loop body
LE: loop exit
PB: predicated region body
PF: predicated region fallthrough
CT: control target
= control target key end

     0   :  { %7 = vsyncpa [#allocation4], 0  ;;  %s777_s0 = inlined_call_operand.vmem [shape: bf16[2,2,8,8], index: 0, kind: input, shape index: {}]   ;;  %s778_s1 = inlined_call_operand.vmem [shape: bf16[2,8,32], index: 1, kind: input, shape index: {}]   ;;  %s779_s2 = inlined_call_operand.hbm [shape: f32[2,8,32], index: 2, kind: output, shape index: {}]  }
   0x1   :  { %9 = vsyncpa [#allocation4 + $0x1], 0  ;;  %s656_s9 = smov 0   ;;  %s658_s10 = smov 0  }
   0x2   :  { %s660_s11 = smov 0   ;;  %s662_s12 = smov 0  }
   0x3   :  { %s664_s13 = smov 0   ;;  %s666_s14 = smov 0  }
   0x4 LB: > { %s466_s15 = sadd.s32 4294967295, %s636_s14   ;;  %s467_s16 = sadd.s32 4294967294, %s636_s14   ;;  %s636_s14 = sphi %s666_s14, %s15_s14   ;;  %s632_s13 = sphi %s664_s13, %s786_s13   ;;  %s628_s12 = sphi %s662_s12, %s785_s12   ;;  %s624_s11 = sphi %s660_s11, %s784_s11   ;;  %s620_s10 = sphi %s658_s10, %s783_s10   ;;  %s616_s9 = sphi %s656_s9, %s782_s9  }
   0x5   : > { %s41_s17 = sadd.s32 1, %s632_s13  ;;  %s110_s18 = sadd.s32 1, %s624_s11 }
   0x6   : > { %p43_p0 = scmp.ge.s32.totalorder %s41_s17, 2  ;;  %p120_p1 = scmp.ne.s32.totalorder %s624_s11, %s620_s10 }
   0x7   : > { %p121_p2 = scmp.eq.s32.totalorder %s466_s15, 1  ;;  %p126_p3 = scmp.ne.s32.totalorder %s620_s10, %s616_s9 }
   0x8   : > { %s788_s17 = smov (%p43_p0, %s41_s17), 0  ;;  %p127_p5 = scmp.eq.s32.totalorder %s467_s16, 1 }
   0x9   : > { %p696_p4 = por %p121_p2, %p120_p1  ;;  %s103_s20 = ssub.s32 %s632_s13, %s788_s17 }
   0xa   : > { %p471_p6 = scmp.ge.s32.totalorder %s636_s14, 1  ;;  %p108_p7 = scmp.eq.s32.totalorder %s103_s20, 0 }
   0xb   : > { %p703_p8 = por %p127_p5, %p126_p3  ;;  %p173_p9 = scmp.lt.s32.totalorder %s636_s14, 3 }
   0xc   : > { %s709_s22 = scalar_select %p108_p7, %s624_s11, %s110_s18  }
   0xd   : > { %p174_p10 = pnand %p471_p6, %p173_p9 }
   0xe   : > { %v242_v0 = vld [vmem:[%s778_s1] sm:$0xf] (!%p174_p10)  ;;  %vm247_vm0 = vcmask (!%p174_p10), 1043456   ;;  %v476_v1 = vld [vmem:[%s778_s1 + $0x4] sm:$0xf] (!%p174_p10)  ;;  %v638_v2 = vmov (!%p174_p10), 0.0  }
   0xf   : > { %177 = sbr.rel (%p174_p10) target bundleno = 265 (0x109), region = 28  ;;  %487 = vmatprep.subr.bf16.mxu1 (!%p174_p10), %v638_v2  ;;  %493 = vmatprep.subr.bf16.mxu0 (!%p174_p10), %v638_v2  ;;  %v249_v3 = vsel (!%p174_p10), %vm247_vm0, %v242_v0, 0  ;;  %v298_v4 = vsel (!%p174_p10), %vm247_vm0, %v476_v1, 0  ;;  %p211_p11 = scmp.lt.s32.totalorder (!%p174_p10), %s628_s12, 1  ;;  %vm237_vm1 = vcmask (!%p174_p10), 261120   ;;  %vm639_vm2 = vmmov (!%p174_p10), 0  }
  0x10   : > { %488 = vmatpush3.bf16.msra.mxu1 (!%p174_p10), %v249_v3  ;;  %494 = vmatpush3.bf16.msra.mxu0 (!%p174_p10), %v298_v4  ;;  %238 = vst.msk [vmem:[#allocation2] sm:$0xff] (!%p174_p10), %vm237_vm1, %v638_v2  ;;  %vm243_vm3 = vcmask (!%p174_p10), 64512   ;;  %s207_s4 = sand.u32 (!%p174_p10), 1, %s620_s10   ;;  %s479_s6 = sshll.u32 (!%p174_p10), %s628_s12, 7 }
  0x11   : > { %489 = vmatprep.mubr.msk.bf16.mxu1 (!%p174_p10), %vm639_vm2, %v638_v2  ;;  %495 = vmatprep.mubr.msk.bf16.mxu0 (!%p174_p10), %vm639_vm2, %v638_v2  ;;  %s472_s5 = sshll.u32 (!%p174_p10), %s207_s4, 3  ;;  %s729_s18 = scalar_lea.hbm (!%p174_p10), %s779_s2, %s479_s6 }
  0x12   : > { %s209_s7 = scalar_lea.vmem (!%p174_p10), [#allocation3], %s472_s5  ;;  %s349_s20 = scalar_lea.sflag (!%p174_p10), [#allocation4], %s207_s4 }
  0x13   : > { %s364_s8 = sshll.u32 (!%p174_p10), %s209_s7, 4  ;;  %s731_s8 = int_to_ptr.vmem [resolvable:$true] %s364_s8 }
  0x14   : > { %s558_s23 = scalar_lea.vmem (!%p174_p10), %s731_s8, 128 }
  0x15   : > { %p559_p12 = scmp.ne.s32.totalorder (!%p174_p10), %s731_s8, %s558_s23 }
  0x16   : > { %s212_s27 = scalar_select %p211_p11, %s628_s12, 1 }
  0x17   : > { %v241_v7 = vld [vmem:[#allocation2] sm:$0xff]  ;;  %p560_p13 = pnand %p559_p12, %p696_p4  ;;  %s640_s12 = smov [#allocation3]  }
  0x18   : > { %s482_s28 = sshll.u32 %s212_s27, 3  ;;  %s562_s24 = sshll.u32 %s640_s12, 4  ;;  %s563_s24 = int_to_ptr.vmem [resolvable:$false] %s562_s24 }
  0x19   : > { %s221_s3 = scalar_lea.vmem %s777_s0, %s482_s28  ;;  %p561_p0 = pneg %p560_p13 }
  0x1a   : > { %v239_v5 = vld [vmem:[%s221_s3] sm:$0xf]  ;;  %v240_v6 = vld [vmem:[%s221_s3 + $0x4] sm:$0xf]  ;;  %s564_s25 = scalar_lea.vmem %s563_s24, 256  ;;  %p565_p1 = scmp.lt.s32.totalorder %s731_s8, %s563_s24 }
  0x1b   : > { %490 = vmatmul.mubr.msk.bf16.vlgmr.msra.gmra.mrb[0].mxu1 %vm243_vm3, %v239_v5  ;;  %496 = vmatmul.mubr.msk.bf16.vlgmr.msra.gmra.mrb[0].mxu0 %vm243_vm3, %v240_v6  ;;  %p566_p2 = scmp.lt.s32.totalorder %s564_s25, %s558_s23 }
  0x1d   : > { %p567_p3 = por %p566_p2, %p565_p1 }
  0x1f   : > { %p568_p5 = pnand %p567_p3, %p561_p0 }
  0xee   : > { %v285_v8 = vpop.f32.mrb[0].mxu1  ;;  %v334_v9 = vpop.f32.mrb[0].mxu0 }
  0xef   : > { %v291_v10 = vadd.f32 %v285_v8, %v241_v7  ;;  %v491_v11 = vpop.f32.mrb[1].mxu1  ;;  %v497_v12 = vpop.f32.mrb[1].mxu0 }
  0xf0   : > { %v288_v13 = vpop.f32.mrb[2].mxu1  ;;  %v337_v14 = vpop.f32.mrb[2].mxu0 }
  0xf1   : > { %v340_v15 = vadd.f32 %v334_v9, %v291_v10  ;;  %v492_v16 = vpop.f32.mrb[3].mxu1  ;;  %v498_v17 = vpop.f32.mrb[3].mxu0 }
  0xf3   : > { %342 = vst.msk [vmem:[#allocation2] sm:$0xff] %vm237_vm1, %v340_v15 }
  0xfa   : > { %v346_v18 = vld [vmem:[#allocation2] sm:$0xff] }
  0xfb   : > { %347 = vst.msk [vmem:[%s209_s7] sm:$0xff] %vm237_vm1, %v346_v18 }
  0xfc   : > { %571 = shalt.err (!%p568_p5)
}
  0xfd   : > { %s572_s26 = scalar_lea.hbm %s729_s18, 128  ;;  %s576_s29 = scalar_lea.hbm %s779_s2, 256 }
  0xfe   : > { %p573_p6 = scmp.ne.s32.totalorder %s729_s18, %s572_s26  ;;  %p577_p10 = scmp.lt.u32.totalorder %s729_s18, %s779_s2 }
  0xff   : > { %p578_p11 = scmp.lt.u32.totalorder %s576_s29, %s572_s26  ;;  %p580_p13 = scmp.lt.u32.totalorder %s572_s26, %s729_s18 }
 0x100   : > { %p574_p7 = pnand %p573_p6, %p696_p4 }
 0x101   : > { %p579_p12 = por %p578_p11, %p577_p10 }
 0x102   : > { %p575_p9 = pneg %p574_p7 }
 0x103   : > { %p581_p0 = por %p580_p13, %p579_p12 }
 0x105   : > { %p582_p1 = pnand %p581_p0, %p575_p9 }
 0x107   : > { %585 = shalt.err (!%p582_p1)
}
 0x108   : > { %501 = dma.vmem_to_hbm [thread:$0]  (%p696_p4), %s731_s8, 128, %s729_s18, %s349_s20  }
 0x109 PF: > { %p507_p2 = scmp.ge.s32.totalorder %s636_s14, 2  ;;  %s376_s4 = sand.u32 1, %s616_s9  }
 0x10a   : > { %s377_s5 = scalar_lea.sflag [#allocation4], %s376_s4 }
 0x10b   : > { %p504_p3 = pnand %p507_p2, %p703_p8 }
 0x10d   : > { %611 = dma.done.wait (!%p504_p3), %s377_s5, 128  }
 0x10e   : > { %613 = vsyncadd (!%p504_p3), %s377_s5, 4294967168  ;;  %s15_s14 = sadd.s32 1, %s636_s14   ;;  %s782_s9 = smov %s620_s10 }
 0x10f   : > { %p12_p5 = scmp.ge.s32.totalorder %s15_s14, 4   ;;  %s783_s10 = smov %s624_s11 }
 0x110   : > { %s784_s11 = smov %s709_s22  ;;  %s785_s12 = smov %s632_s13 }
 0x111   : > { %s786_s13 = smov %s788_s17  ;;  %14 = sbr.rel (!%p12_p5) target bundleno = 4 (0x4), region = 75 }
 0x118   :  { %382 = vsyncpa [#allocation4], 1 }
 0x119   :  { %384 = vsyncpa [#allocation4 + $0x1], 1 }

// kernel: hybrid_attention_forward.10
= control target key start
LH: loop header
LB: loop body
LE: loop exit
PB: predicated region body
PF: predicated region fallthrough
CT: control target
= control target key end

     0   :  { %s632_s9 = smov 0   ;;  %s634_s10 = smov 0   ;;  %s681_s0 = inlined_call_operand.vmem [shape: bf16[2,8,32], index: 0, kind: input, shape index: {}]   ;;  %s682_s1 = inlined_call_operand.vmem [shape: bf16[2,32,8], index: 1, kind: input, shape index: {}]   ;;  %s683_s2 = inlined_call_operand.vmem [shape: bf16[2,2,8,8], index: 2, kind: output, shape index: {}]  }
   0x1   :  { %s636_s11 = smov 0  }
   0x2 LB: > { %s34_s12 = sadd.s32 1, %s609_s10  ;;  %p522_p0 = scmp.ge.s32.totalorder %s613_s11, 1  ;;  %s613_s11 = sphi %s636_s11, %s12_s11   ;;  %s609_s10 = sphi %s634_s10, %s685_s10   ;;  %s605_s9 = sphi %s632_s9, %s684_s9  }
   0x3   : > { %p36_p1 = scmp.ge.s32.totalorder %s34_s12, 2  ;;  %p170_p2 = scmp.lt.s32.totalorder %s613_s11, 3 }
   0x5   : > { %s687_s12 = smov (%p36_p1, %s34_s12), 0  ;;  %p171_p3 = pnand %p522_p0, %p170_p2 }
   0x6   : > { %v587_v0 = vld [vmem:[%s682_s1] sm:$0xff] (!%p171_p3)   ;;  %v615_v1 = vmov (!%p171_p3), 0.0   ;;  %v588_v2 = vld [vmem:[%s682_s1 + $0x10] sm:$0xff] (!%p171_p3)   ;;  %v589_v3 = vld [vmem:[%s682_s1 + $0x8] sm:$0xff] (!%p171_p3)   ;;  %vm616_vm0 = vmmov (!%p171_p3), 0   ;;  %p214_p4 = scmp.lt.s32.totalorder (!%p171_p3), %s605_s9, 1 }
   0x7   : > { %174 = sbr.rel (%p171_p3) target bundleno = 243 (0xf3), region = 28  ;;  %545 = vmatprep.subr.bf16.mxu0 (!%p171_p3), %v615_v1  ;;  %553 = vmatprep.subr.bf16.mxu1 (!%p171_p3), %v615_v1  ;;  %v590_v4 = vld [vmem:[%s682_s1 + $0x18] sm:$0xff] (!%p171_p3)   ;;  %vm254_vm1 = vcmask (!%p171_p3), 64512   ;;  %vm275_vm2 = vcmask (!%p171_p3), 261120   ;;  %vm390_vm3 = vcmask (!%p171_p3), 60416  }
   0x8   : > { %546 = vmatpush3.bf16.msra.mxu0 (!%p171_p3), %v587_v0  ;;  %549 = vmatprep.mubr.msk.bf16.mxu0 (!%p171_p3), %vm616_vm0, %v615_v1  ;;  %255 = vst.msk [vmem:[#allocation2] sm:$0xff] (!%p171_p3), %vm254_vm1, %v615_v1  ;;  %256 = vst.msk [vmem:[#allocation2 + $0x8] sm:$0xff] (!%p171_p3), %vm254_vm1, %v615_v1 }
   0x9   : > { %554 = vmatpush3.bf16.msra.mxu1 (!%p171_p3), %v588_v2  ;;  %547 = vmatprep.subr.bf16.mxu0 (!%p171_p3), %v615_v1 }
   0xa   : > { %555 = vmatprep.subr.bf16.mxu1 (!%p171_p3), %v615_v1  ;;  %557 = vmatprep.mubr.msk.bf16.mxu1 (!%p171_p3), %vm616_vm0, %v615_v1 }
   0xc   : > { %548 = vmatpush3.bf16.msra.mxu0 (!%p171_p3), %v589_v3 }
   0xd   : > { %556 = vmatpush3.bf16.msra.mxu1 (!%p171_p3), %v590_v4 }
   0xe   : > { %s689_s9 = smov (!%p214_p4, %s605_s9), 1 }
   0xf   : > { %s523_s21 = sshll.u32 %s689_s9, 2  ;;  %v258_v6 = vld [vmem:[#allocation2] sm:$0xff]  ;;  %v323_v7 = vld [vmem:[#allocation2 + $0x8] sm:$0xff]  ;;  %s538_s25 = sshll.u32 %s689_s9, 3 }
  0x10   : > { %s223_s24 = scalar_lea.vmem %s681_s0, %s523_s21  ;;  %s247_s28 = scalar_lea.vmem %s683_s2, %s538_s25 }
  0x11   : > { %v257_v5 = vld [vmem:[%s223_s24] sm:$0xf] }
  0x12   : > { %550 = vmatmul.mubr.msk.bf16.vlgmr.msra.gmra.mrb[0].mxu0 %vm275_vm2, %v257_v5  ;;  %558 = vmatmul.mubr.msk.bf16.vlgmr.msra.gmra.mrb[0].mxu1 %vm275_vm2, %v257_v5 }
  0xe5   : > { %v313_v8 = vpop.f32.mrb[0].mxu0  ;;  %v375_v10 = vpop.f32.mrb[0].mxu1 }
  0xe6   : > { %v319_v9 = vadd.f32 %v313_v8, %v258_v6  ;;  %v551_v11 = vpop.f32.mrb[1].mxu0  ;;  %v381_v12 = vadd.f32 %v375_v10, %v323_v7  ;;  %v559_v13 = vpop.f32.mrb[1].mxu1 }
  0xe7   : > { %v316_v14 = vpop.f32.mrb[2].mxu0  ;;  %v378_v15 = vpop.f32.mrb[2].mxu1 }
  0xe8   : > { %321 = vst.msk [vmem:[#allocation2] sm:$0xff] %vm254_vm1, %v319_v9  ;;  %v552_v16 = vpop.f32.mrb[3].mxu0  ;;  %382 = vst.msk [vmem:[#allocation2 + $0x8] sm:$0xff] %vm254_vm1, %v381_v12  ;;  %v560_v17 = vpop.f32.mrb[3].mxu1 }
  0xef   : > { %v386_v18 = vld [vmem:[#allocation2] sm:$0xff]  ;;  %v387_v20 = vld [vmem:[#allocation2 + $0x8] sm:$0xff] }
  0xf0   : > { %v388_v19 = vpack.c.bf16 %v386_v18, %v386_v18  ;;  %v389_v21 = vpack.c.bf16 %v387_v20, %v387_v20 }
  0xf2   : > { %391 = vst.msk [vmem:[%s247_s28] sm:$0xf] %vm390_vm3, %v388_v19  ;;  %392 = vst.msk [vmem:[%s247_s28 + $0x4] sm:$0xf] %vm390_vm3, %v389_v21 }
  0xf3 PF: > { %s12_s11 = sadd.s32 1, %s613_s11   ;;  %s684_s9 = smov %s609_s10 }
  0xf4   : > { %p9_p5 = scmp.ge.s32.totalorder %s12_s11, 4   ;;  %s685_s10 = smov %s687_s12 }
  0xf6   :  { %11 = sbr.rel (!%p9_p5) target bundleno = 2 (0x2), region = 71 }

// kernel: hybrid_attention_forward.13
= control target key start
LH: loop header
LB: loop body
LE: loop exit
PB: predicated region body
PF: predicated region fallthrough
CT: control target
= control target key end

     0   :  { %8 = vsyncpa [#allocation4], 0  ;;  %s992_s0 = inlined_call_operand.vmem [shape: bf16[2,2,8,8], index: 0, kind: input, shape index: {}]   ;;  %s993_s1 = inlined_call_operand.vmem [shape: bf16[2,8,32], index: 1, kind: input, shape index: {}]   ;;  %s994_s2 = inlined_call_operand.hbm [shape: f32[2,8,32], index: 2, kind: input, shape index: {}, may-alias: {2,3}]   ;;  %s995_s3 = inlined_call_operand.hbm [shape: f32[2,8,32], index: 3, kind: output, shape index: {}, may-alias: {2,3}]  }
   0x1   :  { %10 = vsyncpa [#allocation4 + $0x1], 0 }
   0x2   :  { %11 = vsyncpa [#allocation5], 0 }
   0x3   :  { %13 = vsyncpa [#allocation5 + $0x1], 0  ;;  %s802_s12 = smov 0   ;;  %s804_s13 = smov 0  }
   0x4   :  { %s806_s14 = smov 0   ;;  %s808_s15 = smov 0  }
   0x5   :  { %s810_s16 = smov 0   ;;  %s812_s17 = smov 0  }
   0x6 LB: > { %s562_s18 = sadd.s32 4294967295, %s776_s17   ;;  %s563_s19 = sadd.s32 4294967294, %s776_s17   ;;  %s776_s17 = sphi %s812_s17, %s19_s17   ;;  %s772_s16 = sphi %s810_s16, %s1011_s16   ;;  %s768_s15 = sphi %s808_s15, %s1010_s15   ;;  %s764_s14 = sphi %s806_s14, %s1009_s14   ;;  %s760_s13 = sphi %s804_s13, %s1008_s13   ;;  %s756_s12 = sphi %s802_s12, %s1007_s12  }
   0x7   : > { %s45_s20 = sadd.s32 1, %s772_s16  ;;  %s114_s21 = sadd.s32 1, %s764_s14 }
   0x8   : > { %p47_p0 = scmp.ge.s32.totalorder %s45_s20, 2  ;;  %p121_p1 = scmp.ne.s32.totalorder %s764_s14, %s760_s13 }
   0x9   : > { %p122_p2 = scmp.eq.s32.totalorder %s776_s17, 0  ;;  %p127_p3 = scmp.ne.s32.totalorder %s760_s13, %s756_s12 }
   0xa   : > { %s1013_s20 = smov (%p47_p0, %s45_s20), 0  ;;  %p128_p5 = scmp.eq.s32.totalorder %s562_s18, 0 }
   0xb   : > { %p843_p4 = por %p122_p2, %p121_p1  ;;  %s107_s23 = ssub.s32 %s772_s16, %s1013_s20 }
   0xc   : > { %p155_p6 = scmp.eq.s32.totalorder %s562_s18, 1  ;;  %p112_p7 = scmp.eq.s32.totalorder %s107_s23, 0 }
   0xd   : > { %p849_p8 = por %p128_p5, %p127_p3  ;;  %p161_p10 = scmp.eq.s32.totalorder %s563_s19, 1 }
   0xe   : > { %p853_p9 = por %p155_p6, %p121_p1  ;;  %p612_p13 = scmp.lt.s32.totalorder %s776_s17, 2 }
   0xf   : > { %s858_s26 = scalar_select %p112_p7, %s764_s14, %s114_s21  }
  0x10   : > { %s999_s25 = scalar_select %p853_p9, 1, 0 }
  0x11   : > { %p860_p11 = por %p161_p10, %p127_p3  ;;  %s209_s28 = sand.u32 1, %s764_s14  }
  0x12   : > { %s567_s29 = sshll.u32 %s209_s28, 3  ;;  %s568_s30 = sshll.u32 %s772_s16, 7 }
  0x13   : > { %s1000_s27 = scalar_select %p860_p11, 1, 0 }
  0x14   : > { %s871_s6 = scalar_lea.hbm %s994_s2, %s568_s30  ;;  %s213_s7 = scalar_lea.vmem [#allocation3], %s567_s29 }
  0x15   : > { %s222_s8 = sshll.u32 %s213_s7, 4  ;;  %p877_p0 = pnand %p612_p13, %p843_p4  ;;  %s873_s8 = int_to_ptr.vmem [resolvable:$true] %s222_s8 }
  0x16   : > { %s210_s10 = scalar_lea.sflag [#allocation4], %s209_s28  ;;  %s664_s11 = scalar_lea.hbm %s871_s6, 128 }
  0x17   : > { %p665_p3 = scmp.ne.s32.totalorder %s871_s6, %s664_s11  ;;  %p666_p5 = pneg %p877_p0 }
  0x18   : > { %s669_s21 = scalar_lea.hbm %s994_s2, 256  ;;  %p670_p4 = scmp.lt.u32.totalorder %s871_s6, %s994_s2 }
  0x19   : > { %p667_p6 = pnand %p666_p5, %p665_p3  ;;  %p671_p10 = scmp.lt.u32.totalorder %s669_s21, %s664_s11 }
  0x1a   : > { %p673_p12 = scmp.lt.u32.totalorder %s664_s11, %s871_s6 }
  0x1b   : > { %p668_p7 = pneg %p667_p6  ;;  %p672_p13 = por %p671_p10, %p670_p4 }
  0x1d   : > { %p674_p1 = por %p673_p12, %p672_p13 }
  0x1f   : > { %p675_p2 = pnand %p674_p1, %p668_p7 }
  0x21   : > { %678 = shalt.err (!%p675_p2)
}
  0x22   : > { %s679_s28 = scalar_lea.vmem %s873_s8, 128  ;;  %s778_s29 = smov [#allocation3]  }
  0x23   : > { %p680_p3 = scmp.ne.s32.totalorder %s873_s8, %s679_s28  ;;  %s684_s30 = sshll.u32 %s778_s29, 4  ;;  %s685_s30 = int_to_ptr.vmem [resolvable:$false] %s684_s30 }
  0x24   : > { %s686_s4 = scalar_lea.vmem %s685_s30, 256  ;;  %p687_p9 = scmp.lt.s32.totalorder %s873_s8, %s685_s30 }
  0x25   : > { %p682_p6 = pnand %p680_p3, %p666_p5  ;;  %p688_p4 = scmp.lt.s32.totalorder %s686_s4, %s679_s28 }
  0x27   : > { %p683_p11 = pneg %p682_p6  ;;  %p689_p10 = por %p688_p4, %p687_p9 }
  0x29   : > { %p690_p12 = pnand %p689_p10, %p683_p11 }
  0x2b   : > { %693 = shalt.err (!%p690_p12)
}
  0x2c   : > { %607 = dma.hbm_to_vmem [thread:$0]  (!%p877_p0), %s871_s6, 128, %s873_s8, %s210_s10  }
  0x2d   : > { %p1002_p1 = scmp.lt.s32.totalorder %s776_s17, 3  ;;  %p1003_p2 = scmp.ge.s32.totalorder %s776_s17, 1 }
  0x2f   : > { %p228_p5 = pnand %p1003_p2, %p1002_p1 }
  0x30   : > { %s913_s5 = sand.u32 (!%p228_p5), 1, %s760_s13  }
  0x31   : > { %231 = sbr.rel (%p228_p5) target bundleno = 302 (0x12e), region = 32  ;;  %s570_s7 = sshll.u32 (!%p228_p5), %s913_s5, 3 }
  0x32   : > { %s234_s11 = scalar_lea.sflag (!%p228_p5), [#allocation4], %s913_s5  ;;  %s237_s9 = scalar_lea.vmem (!%p228_p5), [#allocation3], %s570_s7 }
  0x38   : > { %747 = dma.done.wait (%p849_p8), %s234_s11, 128  }
  0x39   : > { %749 = vsyncadd (%p849_p8), %s234_s11, 4294967168  ;;  %p281_p9 = scmp.lt.s32.totalorder %s768_s15, 1  ;;  %v779_v0 = vmov 0.0   ;;  %vm780_vm0 = vmmov 0   ;;  %vm318_vm1 = vcmask 1043456   ;;  %vm308_vm2 = vcmask 261120  }
  0x3a   : > { %586 = vmatprep.subr.bf16.mxu1 %v779_v0  ;;  %592 = vmatprep.subr.bf16.mxu0 %v779_v0  ;;  %v313_v1 = vld [vmem:[%s993_s1] sm:$0xf]  ;;  %v575_v2 = vld [vmem:[%s993_s1 + $0x4] sm:$0xf]  ;;  %v307_v5 = vld [vmem:[%s237_s9] sm:$0xff]  ;;  %vm314_vm3 = vcmask 64512  }
  0x3b   : > { %588 = vmatprep.mubr.msk.bf16.mxu1 %vm780_vm0, %v779_v0  ;;  %594 = vmatprep.mubr.msk.bf16.mxu0 %vm780_vm0, %v779_v0  ;;  %s282_s6 = scalar_select %p281_p9, %s768_s15, 1  ;;  %v320_v3 = vsel %vm318_vm1, %v313_v1, 0  ;;  %v369_v4 = vsel %vm318_vm1, %v575_v2, 0  ;;  %309 = vst.msk [vmem:[#allocation2] sm:$0xff] %vm308_vm2, %v307_v5 }
  0x3c   : > { %587 = vmatpush3.bf16.msra.mxu1 %v320_v3  ;;  %593 = vmatpush3.bf16.msra.mxu0 %v369_v4  ;;  %s578_s28 = sshll.u32 %s768_s15, 7  ;;  %s279_s29 = scalar_lea.vmem [#allocation6], %s570_s7 }
  0x3d   : > { %s581_s8 = sshll.u32 %s282_s6, 3  ;;  %s435_s30 = sshll.u32 %s279_s29, 4  ;;  %s944_s30 = int_to_ptr.vmem [resolvable:$true] %s435_s30 }
  0x3e   : > { %s291_s19 = scalar_lea.vmem %s992_s0, %s581_s8  ;;  %s942_s9 = scalar_lea.hbm %s995_s3, %s578_s28 }
  0x3f   : > { %v310_v6 = vld [vmem:[%s291_s19] sm:$0xf]  ;;  %v311_v7 = vld [vmem:[%s291_s19 + $0x4] sm:$0xf]  ;;  %s420_s6 = scalar_lea.sflag [#allocation5], %s913_s5  ;;  %s694_s8 = scalar_lea.vmem %s944_s30, 128 }
  0x40   : > { %589 = vmatmul.mubr.msk.bf16.vlgmr.msra.gmra.mrb[0].mxu1 %vm314_vm3, %v310_v6  ;;  %595 = vmatmul.mubr.msk.bf16.vlgmr.msra.gmra.mrb[0].mxu0 %vm314_vm3, %v311_v7  ;;  %p695_p8 = scmp.ne.s32.totalorder %s944_s30, %s694_s8  ;;  %p1004_p11 = scmp.ne.s32.totalorder %s999_s25, 0 }
  0x41   : > { %s781_s15 = smov [#allocation6]  }
  0x42   : > { %v312_v8 = vld [vmem:[#allocation2] sm:$0xff]  ;;  %p696_p0 = pnand %p695_p8, %p1004_p11  ;;  %s698_s7 = sshll.u32 %s781_s15, 4  ;;  %s699_s7 = int_to_ptr.vmem [resolvable:$false] %s698_s7 }
  0x43   : > { %s700_s10 = scalar_lea.vmem %s699_s7, 256  ;;  %p701_p13 = scmp.lt.s32.totalorder %s944_s30, %s699_s7 }
  0x44   : > { %p697_p7 = pneg %p696_p0  ;;  %p702_p3 = scmp.lt.s32.totalorder %s700_s10, %s694_s8 }
  0x46   : > { %p703_p6 = por %p702_p3, %p701_p13 }
  0x48   : > { %p704_p4 = pnand %p703_p6, %p697_p7 }
 0x113   : > { %v356_v9 = vpop.f32.mrb[0].mxu1  ;;  %v405_v10 = vpop.f32.mrb[0].mxu0 }
 0x114   : > { %v362_v11 = vadd.f32 %v356_v9, %v312_v8  ;;  %v590_v12 = vpop.f32.mrb[1].mxu1  ;;  %v596_v13 = vpop.f32.mrb[1].mxu0 }
 0x115   : > { %v359_v14 = vpop.f32.mrb[2].mxu1  ;;  %v408_v15 = vpop.f32.mrb[2].mxu0 }
 0x116   : > { %v411_v16 = vadd.f32 %v405_v10, %v362_v11  ;;  %v591_v17 = vpop.f32.mrb[3].mxu1  ;;  %v597_v18 = vpop.f32.mrb[3].mxu0 }
 0x118   : > { %413 = vst.msk [vmem:[#allocation2] sm:$0xff] %vm308_vm2, %v411_v16 }
 0x11f   : > { %v417_v19 = vld [vmem:[#allocation2] sm:$0xff] }
 0x120   : > { %418 = vst.msk [vmem:[%s279_s29] sm:$0xff] %vm308_vm2, %v417_v19 }
 0x121   : > { %707 = shalt.err (!%p704_p4)
}
 0x122   : > { %s708_s5 = scalar_lea.hbm %s942_s9, 128  ;;  %s712_s21 = scalar_lea.hbm %s995_s3, 256 }
 0x123   : > { %p709_p10 = scmp.ne.s32.totalorder %s942_s9, %s708_s5  ;;  %p713_p2 = scmp.lt.u32.totalorder %s942_s9, %s995_s3 }
 0x124   : > { %p714_p5 = scmp.lt.u32.totalorder %s712_s21, %s708_s5  ;;  %p716_p8 = scmp.lt.u32.totalorder %s708_s5, %s942_s9 }
 0x125   : > { %p710_p12 = pnand %p709_p10, %p1004_p11 }
 0x126   : > { %p715_p9 = por %p714_p5, %p713_p2 }
 0x127   : > { %p711_p1 = pneg %p710_p12 }
 0x128   : > { %p717_p0 = por %p716_p8, %p715_p9 }
 0x12a   : > { %p718_p7 = pnand %p717_p0, %p711_p1 }
 0x12c   : > { %721 = shalt.err (!%p718_p7)
}
 0x12d   : > { %602 = dma.vmem_to_hbm [thread:$0]  (%p1004_p11), %s944_s30, 128, %s942_s9, %s420_s6  }
 0x12e PF: > { %s447_s23 = sand.u32 1, %s756_s12   ;;  %p1005_p13 = scmp.ne.s32.totalorder %s1000_s27, 0 }
 0x12f   : > { %p1006_p3 = scmp.ge.s32.totalorder %s776_s17, 2  ;;  %s448_s28 = scalar_lea.sflag [#allocation5], %s447_s23 }
 0x131   : > { %p609_p6 = pnand %p1006_p3, %p1005_p13 }
 0x133   : > { %751 = dma.done.wait (!%p609_p6), %s448_s28, 128  }
 0x134   : > { %753 = vsyncadd (!%p609_p6), %s448_s28, 4294967168  ;;  %s19_s17 = sadd.s32 1, %s776_s17   ;;  %s1007_s12 = smov %s760_s13 }
 0x135   : > { %p16_p4 = scmp.ge.s32.totalorder %s19_s17, 4   ;;  %s1008_s13 = smov %s764_s14 }
 0x136   : > { %s1009_s14 = smov %s858_s26  ;;  %s1010_s15 = smov %s772_s16 }
 0x137   : > { %s1011_s16 = smov %s1013_s20  ;;  %18 = sbr.rel (!%p16_p4) target bundleno = 6 (0x6), region = 92 }
 0x13e   :  { %453 = vsyncpa [#allocation4], 1 }
 0x13f   :  { %455 = vsyncpa [#allocation4 + $0x1], 1 }
 0x140   :  { %456 = vsyncpa [#allocation5], 1 }
 0x141   :  { %458 = vsyncpa [#allocation5 + $0x1], 1 }

// kernel: hybrid_attention_forward.11
= control target key start
LH: loop header
LB: loop body
LE: loop exit
PB: predicated region body
PF: predicated region fallthrough
CT: control target
= control target key end

     0   :  { %s802_s9 = smov 0   ;;  %s804_s10 = smov 0   ;;  %s883_s0 = inlined_call_operand.vmem [shape: bf16[2,8,32], index: 0, kind: input, shape index: {}]   ;;  %s884_s1 = inlined_call_operand.vmem [shape: bf16[4,32,8], index: 1, kind: input, shape index: {}]   ;;  %s885_s2 = inlined_call_operand.vmem [shape: bf16[2,4,8,8], index: 2, kind: output, shape index: {}]  }
   0x1   :  { %s806_s11 = smov 0  }
   0x2 LB: > { %s34_s12 = sadd.s32 1, %s779_s10  ;;  %p652_p0 = scmp.ge.s32.totalorder %s783_s11, 1  ;;  %s783_s11 = sphi %s806_s11, %s12_s11   ;;  %s779_s10 = sphi %s804_s10, %s887_s10   ;;  %s775_s9 = sphi %s802_s9, %s886_s9  }
   0x3   : > { %p36_p1 = scmp.ge.s32.totalorder %s34_s12, 2  ;;  %p170_p2 = scmp.lt.s32.totalorder %s783_s11, 3 }
   0x5   : > { %s889_s12 = smov (%p36_p1, %s34_s12), 0  ;;  %p171_p3 = pnand %p652_p0, %p170_p2 }
   0x6   : > { %v753_v0 = vld [vmem:[%s884_s1] sm:$0xff] (!%p171_p3)   ;;  %v785_v1 = vmov (!%p171_p3), 0.0   ;;  %v754_v2 = vld [vmem:[%s884_s1 + $0x10] sm:$0xff] (!%p171_p3)   ;;  %v755_v3 = vld [vmem:[%s884_s1 + $0x8] sm:$0xff] (!%p171_p3)   ;;  %vm786_vm0 = vmmov (!%p171_p3), 0   ;;  %p214_p4 = scmp.lt.s32.totalorder (!%p171_p3), %s775_s9, 1 }
   0x7   : > { %174 = sbr.rel (%p171_p3) target bundleno = 251 (0xfb), region = 28  ;;  %695 = vmatprep.subr.bf16.mxu0 (!%p171_p3), %v785_v1  ;;  %703 = vmatprep.subr.bf16.mxu1 (!%p171_p3), %v785_v1  ;;  %v756_v4 = vld [vmem:[%s884_s1 + $0x18] sm:$0xff] (!%p171_p3)   ;;  %vm277_vm1 = vcmask (!%p171_p3), 261120   ;;  %vm254_vm2 = vcmask (!%p171_p3), 64512   ;;  %v757_v5 = vld [vmem:[%s884_s1 + $0x20] sm:$0xff] (!%p171_p3)   ;;  %v758_v6 = vld [vmem:[%s884_s1 + $0x30] sm:$0xff] (!%p171_p3)  }
   0x8   : > { %696 = vmatpush3.bf16.msra.mxu0 (!%p171_p3), %v753_v0  ;;  %699 = vmatprep.mubr.msk.bf16.mxu0 (!%p171_p3), %vm786_vm0, %v785_v1  ;;  %255 = vst.msk [vmem:[#allocation2] sm:$0xff] (!%p171_p3), %vm254_vm2, %v785_v1  ;;  %256 = vst.msk [vmem:[#allocation2 + $0x8] sm:$0xff] (!%p171_p3), %vm254_vm2, %v785_v1  ;;  %v759_v8 = vld [vmem:[%s884_s1 + $0x28] sm:$0xff] (!%p171_p3)   ;;  %v760_v9 = vld [vmem:[%s884_s1 + $0x38] sm:$0xff] (!%p171_p3)   ;;  %vm518_vm3 = vcmask (!%p171_p3), 60416  }
   0x9   : > { %704 = vmatpush3.bf16.msra.mxu1 (!%p171_p3), %v754_v2  ;;  %697 = vmatprep.subr.bf16.mxu0 (!%p171_p3), %v785_v1  ;;  %257 = vst.msk [vmem:[#allocation2 + $0x10] sm:$0xff] (!%p171_p3), %vm254_vm2, %v785_v1  ;;  %258 = vst.msk [vmem:[#allocation2 + $0x18] sm:$0xff] (!%p171_p3), %vm254_vm2, %v785_v1 }
   0xa   : > { %705 = vmatprep.subr.bf16.mxu1 (!%p171_p3), %v785_v1  ;;  %707 = vmatprep.mubr.msk.bf16.mxu1 (!%p171_p3), %vm786_vm0, %v785_v1 }
   0xc   : > { %698 = vmatpush3.bf16.msra.mxu0 (!%p171_p3), %v755_v3 }
   0xd   : > { %706 = vmatpush3.bf16.msra.mxu1 (!%p171_p3), %v756_v4  ;;  %711 = vmatprep.subr.bf16.mxu0 (!%p171_p3), %v785_v1 }
   0xe   : > { %s891_s9 = smov (!%p214_p4, %s775_s9), 1  ;;  %719 = vmatprep.subr.bf16.mxu1 %v785_v1 }
   0xf   : > { %s653_s21 = sshll.u32 %s891_s9, 2  ;;  %v260_v10 = vld [vmem:[#allocation2] sm:$0xff]  ;;  %v325_v11 = vld [vmem:[#allocation2 + $0x8] sm:$0xff]  ;;  %s682_s5 = sshll.u32 %s891_s9, 4 }
  0x10   : > { %s223_s26 = scalar_lea.vmem %s883_s0, %s653_s21  ;;  %v386_v22 = vld [vmem:[#allocation2 + $0x10] sm:$0xff]  ;;  %v447_v23 = vld [vmem:[#allocation2 + $0x18] sm:$0xff]  ;;  %s247_s8 = scalar_lea.vmem %s885_s2, %s682_s5 }
  0x11   : > { %v259_v7 = vld [vmem:[%s223_s26] sm:$0xf] }
  0x12   : > { %700 = vmatmul.mubr.msk.bf16.vlgmr.msra.gmra.mrb[0].mxu0 %vm277_vm1, %v259_v7  ;;  %708 = vmatmul.mubr.msk.bf16.vlgmr.msra.gmra.mrb[0].mxu1 %vm277_vm1, %v259_v7 }
  0x13   : > { %712 = vmatpush3.bf16.msra.mxu0 %v757_v5  ;;  %720 = vmatpush3.bf16.msra.mxu1 %v758_v6 }
  0x14   : > { %713 = vmatprep.subr.bf16.mxu0 %v785_v1  ;;  %721 = vmatprep.subr.bf16.mxu1 %v785_v1 }
  0x15   : > { %715 = vmatprep.mubr.msk.bf16.mxu0 %vm786_vm0, %v785_v1  ;;  %723 = vmatprep.mubr.msk.bf16.mxu1 %vm786_vm0, %v785_v1 }
  0x17   : > { %714 = vmatpush3.bf16.msra.mxu0 %v759_v8  ;;  %722 = vmatpush3.bf16.msra.mxu1 %v760_v9 }
  0x1a   : > { %716 = vmatmul.mubr.msk.bf16.vlgmr.msra.gmra.mrb[4].mxu0 %vm277_vm1, %v259_v7  ;;  %724 = vmatmul.mubr.msk.bf16.vlgmr.msra.gmra.mrb[4].mxu1 %vm277_vm1, %v259_v7 }
  0xe5   : > { %v315_v12 = vpop.f32.mrb[0].mxu0  ;;  %v377_v14 = vpop.f32.mrb[0].mxu1 }
  0xe6   : > { %v321_v13 = vadd.f32 %v315_v12, %v260_v10  ;;  %v701_v15 = vpop.f32.mrb[1].mxu0  ;;  %v383_v16 = vadd.f32 %v377_v14, %v325_v11  ;;  %v709_v17 = vpop.f32.mrb[1].mxu1 }
  0xe7   : > { %v318_v18 = vpop.f32.mrb[2].mxu0  ;;  %v380_v19 = vpop.f32.mrb[2].mxu1 }
  0xe8   : > { %323 = vst.msk [vmem:[#allocation2] sm:$0xff] %vm254_vm2, %v321_v13  ;;  %v702_v20 = vpop.f32.mrb[3].mxu0  ;;  %384 = vst.msk [vmem:[#allocation2 + $0x8] sm:$0xff] %vm254_vm2, %v383_v16  ;;  %v710_v21 = vpop.f32.mrb[3].mxu1 }
  0xed   : > { %v438_v24 = vpop.f32.mrb[4].mxu0  ;;  %v499_v26 = vpop.f32.mrb[4].mxu1 }
  0xee   : > { %v444_v25 = vadd.f32 %v438_v24, %v386_v22  ;;  %v717_v27 = vpop.f32.mrb[5].mxu0  ;;  %v505_v29 = vadd.f32 %v499_v26, %v447_v23  ;;  %v725_v30 = vpop.f32.mrb[5].mxu1 }
  0xef   : > { %v510_v28 = vld [vmem:[#allocation2] sm:$0xff]  ;;  %v441_v31 = vpop.f32.mrb[6].mxu0  ;;  %v511_v33 = vld [vmem:[#allocation2 + $0x8] sm:$0xff]  ;;  %v502_v34 = vpop.f32.mrb[6].mxu1 }
  0xf0   : > { %v514_v32 = vpack.c.bf16 %v510_v28, %v510_v28  ;;  %445 = vst.msk [vmem:[#allocation2 + $0x10] sm:$0xff] %vm254_vm2, %v444_v25  ;;  %v718_v35 = vpop.f32.mrb[7].mxu0  ;;  %v515_v36 = vpack.c.bf16 %v511_v33, %v511_v33  ;;  %506 = vst.msk [vmem:[#allocation2 + $0x18] sm:$0xff] %vm254_vm2, %v505_v29  ;;  %v726_v37 = vpop.f32.mrb[7].mxu1 }
  0xf2   : > { %519 = vst.msk [vmem:[%s247_s8] sm:$0xf] %vm518_vm3, %v514_v32  ;;  %520 = vst.msk [vmem:[%s247_s8 + $0x4] sm:$0xf] %vm518_vm3, %v515_v36 }
  0xf7   : > { %v512_v38 = vld [vmem:[#allocation2 + $0x10] sm:$0xff]  ;;  %v513_v40 = vld [vmem:[#allocation2 + $0x18] sm:$0xff] }
  0xf8   : > { %v516_v39 = vpack.c.bf16 %v512_v38, %v512_v38  ;;  %v517_v41 = vpack.c.bf16 %v513_v40, %v513_v40 }
  0xfa   : > { %521 = vst.msk [vmem:[%s247_s8 + $0x8] sm:$0xf] %vm518_vm3, %v516_v39  ;;  %522 = vst.msk [vmem:[%s247_s8 + $0xc] sm:$0xf] %vm518_vm3, %v517_v41 }
  0xfb PF: > { %s12_s11 = sadd.s32 1, %s783_s11   ;;  %s886_s9 = smov %s779_s10 }
  0xfc   : > { %p9_p5 = scmp.ge.s32.totalorder %s12_s11, 4   ;;  %s887_s10 = smov %s889_s12 }
  0xfe   :  { %11 = sbr.rel (!%p9_p5) target bundleno = 2 (0x2), region = 75 }

// kernel: hybrid_attention_forward.12
= control target key start
LH: loop header
LB: loop body
LE: loop exit
PB: predicated region body
PF: predicated region fallthrough
CT: control target
= control target key end

     0   :  { %s939_s12 = smov 0   ;;  %s941_s13 = smov 0   ;;  %s1016_s0 = inlined_call_operand.vmem [shape: bf16[2,2,8,8], index: 0, kind: input, shape index: {}]   ;;  %s1017_s1 = inlined_call_operand.vmem [shape: bf16[2,4,8,8], index: 1, kind: input, shape index: {}, may-alias: {1,2}]   ;;  %s1018_s2 = inlined_call_operand.vmem [shape: bf16[2,4,8,8], index: 2, kind: input, shape index: {}, may-alias: {1,2}]   ;;  %s1019_s3 = inlined_call_operand.vmem [shape: bf16[2,2,8,8], index: 3, kind: output, shape index: {}]  }
   0x1   :  { %s943_s14 = smov 0  }
   0x2 LB: > { %s39_s15 = sadd.s32 1, %s909_s13  ;;  %p796_p0 = scmp.ge.s32.totalorder %s913_s14, 1  ;;  %s913_s14 = sphi %s943_s14, %s13_s14   ;;  %s909_s13 = sphi %s941_s13, %s1021_s13   ;;  %s905_s12 = sphi %s939_s12, %s1020_s12  }
   0x3   : > { %p41_p1 = scmp.ge.s32.totalorder %s39_s15, 2  ;;  %p227_p2 = scmp.lt.s32.totalorder %s913_s14, 3 }
   0x5   : > { %s1023_s15 = smov (%p41_p1, %s39_s15), 0  ;;  %p228_p3 = pnand %p796_p0, %p227_p2 }
   0x6   : > { %p291_p4 = scmp.lt.s32.totalorder (!%p228_p3), %s905_s12, 1  ;;  %vm354_vm0 = vcmask (!%p228_p3), 64512   ;;  %v915_v0 = vmov (!%p228_p3), 0.0   ;;  %vm916_vm1 = vmmov (!%p228_p3), 0   ;;  %vm349_vm2 = vcmask (!%p228_p3), 7168  }
   0x7   : > { %231 = sbr.rel (%p228_p3) target bundleno = 827 (0x33b), region = 32  ;;  %825 = vmatprep.subr.bf16.mxu0 (!%p228_p3), %v915_v0  ;;  %355 = vst.msk [vmem:[#allocation4] sm:$0xff] (!%p228_p3), %vm354_vm0, %v915_v0  ;;  %356 = vst.msk [vmem:[#allocation4 + $0x8] sm:$0xff] (!%p228_p3), %vm354_vm0, %v915_v0  ;;  %831 = vmatprep.subr.bf16.mxu1 (!%p228_p3), %v915_v0  ;;  %v917_v7 = vmov (!%p228_p3), -inf   ;;  %v918_v18 = vmov (!%p228_p3), 0   ;;  %vm522_vm3 = vcmask (!%p228_p3), 1043456  }
   0x8   : > { %827 = vmatprep.mubr.msk.bf16.mxu0 (!%p228_p3), %vm916_vm1, %v915_v0  ;;  %833 = vmatprep.mubr.msk.bf16.mxu1 (!%p228_p3), %vm916_vm1, %v915_v0  ;;  %350 = vst.msk [vmem:[#allocation2] sm:$0xff] (!%p228_p3), %vm349_vm2, %v917_v7  ;;  %351 = vst.msk [vmem:[#allocation2 + $0x8] sm:$0xff] (!%p228_p3), %vm349_vm2, %v917_v7  ;;  %vm641_vm4 = vcmask (!%p228_p3), 60416  }
   0x9   : > { %352 = vst.msk [vmem:[#allocation3] sm:$0xff] (!%p228_p3), %vm349_vm2, %v915_v0  ;;  %353 = vst.msk [vmem:[#allocation3 + $0x8] sm:$0xff] (!%p228_p3), %vm349_vm2, %v915_v0  ;;  %877 = vset.pattern.permute.xlu1 (!%p228_p3), %v918_v18  ;;  %878 = vset.pattern.permute.xlu0 (!%p228_p3), %v918_v18 }
   0xe   : > { %s1025_s12 = smov (!%p291_p4, %s905_s12), 1  ;;  %v501_v59 = vld [vmem:[#allocation4] sm:$0xff]  ;;  %v502_v62 = vld [vmem:[#allocation4 + $0x8] sm:$0xff] }
   0xf   : > { %s812_s16 = sshll.u32 %s1025_s12, 4  ;;  %s811_s20 = sshll.u32 %s1025_s12, 3  ;;  %v454_v19 = vld [vmem:[#allocation2] sm:$0xff]  ;;  %v455_v22 = vld [vmem:[#allocation2 + $0x8] sm:$0xff] }
  0x10   : > { %s314_s19 = scalar_lea.vmem %s1017_s1, %s812_s16  ;;  %s301_s23 = scalar_lea.vmem %s1016_s0, %s811_s20  ;;  %v486_v47 = vld [vmem:[#allocation3] sm:$0xff]  ;;  %v487_v50 = vld [vmem:[#allocation3 + $0x8] sm:$0xff] }
  0x11   : > { %v359_v1 = vld [vmem:[%s314_s19] sm:$0xf]  ;;  %v360_v2 = vld [vmem:[%s314_s19 + $0x4] sm:$0xf]  ;;  %s814_s24 = sadd.s32 8, %s812_s16  ;;  %s342_s30 = scalar_lea.vmem %s1019_s3, %s811_s20 }
  0x12   : > { %v366_v3 = vsel %vm354_vm0, %v359_v1, 0  ;;  %v412_v4 = vsel %vm354_vm0, %v360_v2, 0  ;;  %v357_v5 = vld [vmem:[%s301_s23] sm:$0xf]  ;;  %v358_v6 = vld [vmem:[%s301_s23 + $0x4] sm:$0xf]  ;;  %s328_s27 = scalar_lea.vmem %s1018_s2, %s814_s24 }
  0x13   : > { %826 = vmatpush3.bf16.xpose.msra.mxu0 %v366_v3  ;;  %832 = vmatpush3.bf16.xpose.msra.mxu1 %v412_v4  ;;  %v517_v27 = vld [vmem:[%s328_s27] sm:$0xf]  ;;  %v518_v29 = vld [vmem:[%s328_s27 + $0x4] sm:$0xf] }
  0x14   : > { %837 = vmatprep.subr.bf16.mxu0 %v915_v0  ;;  %843 = vmatprep.subr.bf16.mxu1 %v915_v0  ;;  %v524_v28 = vsel %vm522_vm3, %v517_v27, 0  ;;  %v570_v30 = vsel %vm522_vm3, %v518_v29, 0 }
  0x1a   : > { %828 = vmatmul.mubr.msk.bf16.vlgmr.msra.gmra.mrb[0].mxu0 %vm354_vm0, %v357_v5  ;;  %834 = vmatmul.mubr.msk.bf16.vlgmr.msra.gmra.mrb[0].mxu1 %vm354_vm0, %v358_v6 }
  0x1b   : > { %839 = vmatprep.mubr.msk.bf16.mxu0 %vm916_vm1, %v915_v0  ;;  %845 = vmatprep.mubr.msk.bf16.mxu1 %vm916_vm1, %v915_v0 }
  0x1c   : > { %838 = vmatpush3.bf16.msra.mxu0 %v524_v28  ;;  %844 = vmatpush3.bf16.msra.mxu1 %v570_v30 }
  0xed   : > { %v402_v8 = vpop.f32.mrb[0].mxu0  ;;  %v448_v9 = vpop.f32.mrb[0].mxu1 }
  0xee   : > { %v829_v10 = vpop.f32.mrb[1].mxu0  ;;  %v835_v11 = vpop.f32.mrb[1].mxu1  ;;  %v456_v12 = vsel %vm354_vm0, %v402_v8, -inf  ;;  %v459_v17 = vsel %vm354_vm0, %v448_v9, -inf }
  0xef   : > { %457 = vmax.xlane.f32.xlu0 %v456_v12  ;;  %v405_v13 = vpop.f32.mrb[2].mxu0  ;;  %v451_v14 = vpop.f32.mrb[2].mxu1 }
  0xf0   : > { %v830_v15 = vpop.f32.mrb[3].mxu0  ;;  %v836_v16 = vpop.f32.mrb[3].mxu1 }
  0xf3   : > { %460 = vmax.xlane.f32.xlu0 %v459_v17 }
 0x17c   : > { %v458_v20 = vpop.xlane.xlu0 %457 }
 0x17d   : > { %v462_v21 = vmax.f32 %v454_v19, %v458_v20 }
 0x17f   : > { %v464_v23 = vsub.f32 %v454_v19, %v462_v21  ;;  %616 = vst.msk [vmem:[#allocation2] sm:$0xff] %vm349_vm2, %v462_v21  ;;  %472 = vperm.xlu1 %877, %v462_v21  }
 0x180   : > { %v461_v24 = vpop.xlane.xlu0 %460 }
 0x181   : > { %v463_v25 = vmax.f32 %v455_v22, %v461_v24  ;;  %v466_v44 = vmul.f32 1.442695, %v464_v23 }
 0x183   : > { %v465_v26 = vsub.f32 %v455_v22, %v463_v25  ;;  %617 = vst.msk [vmem:[#allocation2 + $0x8] sm:$0xff] %vm349_vm2, %v463_v25  ;;  %477 = vperm.xlu1 %877, %v463_v25  }
 0x185   : > { %v468_v43 = vmul.f32 1.442695, %v465_v26 }
 0x1fe   : > { %v473_v31 = vpop.permute.xlu1 %472 }
 0x1ff   : > { %v480_v32 = vsub.f32 %v402_v8, %v473_v31 }
 0x201   : > { %v482_v33 = vmul.f32 1.442695, %v480_v32 }
 0x202   : > { %v478_v34 = vpop.permute.xlu1 %477 }
 0x203   : > { %879 = vpow2.f32 %v482_v33  ;;  %v481_v35 = vsub.f32 %v448_v9, %v478_v34 }
 0x205   : > { %v484_v36 = vmul.f32 1.442695, %v481_v35 }
 0x207   : > { %881 = vpow2.f32 %v484_v36 }
 0x208   : > { %883 = vpow2.f32 %v468_v43 }
 0x209   : > { %885 = vpow2.f32 %v466_v44 }
 0x20d   : > { %v880_v37 = vpop.eup %879 }
 0x20e   : > { %v490_v38 = vsel %vm354_vm0, %v880_v37, 0.0  ;;  %v515_v39 = vpack.c.bf16 %v880_v37, %v880_v37 }
 0x20f   : > { %491 = vadd.xlane.f32.xlu0 %v490_v38 }
 0x210   : > { %840 = vmatmul.mubr.msk.bf16.vlgmr.msra.gmra.mrb[4].mxu0 %vm354_vm0, %v515_v39 }
 0x211   : > { %v882_v40 = vpop.eup %881 }
 0x212   : > { %v493_v41 = vsel %vm354_vm0, %v882_v40, 0.0  ;;  %v516_v42 = vpack.c.bf16 %v882_v40, %v882_v40  ;;  %v884_v45 = vpop.eup %883 }
 0x213   : > { %494 = vadd.xlane.f32.xlu1 %v493_v41  ;;  %v886_v46 = vpop.eup %885  ;;  %v489_v52 = vmul.f32 %v884_v45, %v487_v50 }
 0x214   : > { %846 = vmatmul.mubr.msk.bf16.vlgmr.msra.gmra.mrb[4].mxu1 %vm354_vm0, %v516_v42  ;;  %v488_v48 = vmul.f32 %v886_v46, %v486_v47 }
 0x224   : > { %510 = vperm.xlu1 %877, %v884_v45  }
 0x225   : > { %505 = vperm.xlu0 %878, %v886_v46  }
 0x29c   : > { %v492_v49 = vpop.xlane.xlu0 %491 }
 0x29d   : > { %v496_v51 = vadd.f32 %v492_v49, %v488_v48 }
 0x29f   : > { %499 = vst.msk [vmem:[#allocation3] sm:$0xff] %vm349_vm2, %v496_v51 }
 0x2a0   : > { %v495_v53 = vpop.xlane.xlu1 %494 }
 0x2a1   : > { %v497_v54 = vadd.f32 %v495_v53, %v489_v52 }
 0x2a3   : > { %500 = vst.msk [vmem:[#allocation3 + $0x8] sm:$0xff] %vm349_vm2, %v497_v54 }
 0x2a4   : > { %v506_v60 = vpop.permute.xlu0 %505  ;;  %v511_v63 = vpop.permute.xlu1 %510 }
 0x2a5   : > { %v513_v61 = vmul.f32 %v506_v60, %v501_v59  ;;  %v514_v4 = vmul.f32 %v511_v63, %v502_v62 }
 0x2a6   : > { %v623_v55 = vld [vmem:[#allocation3] sm:$0xff] }
 0x2a7   : > { %887 = vrcp.f32 %v623_v55 }
 0x2aa   : > { %v624_v56 = vld [vmem:[#allocation3 + $0x8] sm:$0xff] }
 0x2ab   : > { %889 = vrcp.f32 %v624_v56 }
 0x2b1   : > { %v888_v57 = vpop.eup %887 }
 0x2b2   : > { %629 = vperm.xlu0 %878, %v888_v57  }
 0x2b5   : > { %v890_v58 = vpop.eup %889 }
 0x2b6   : > { %634 = vperm.xlu0 %878, %v890_v58  }
 0x2e3   : > { %v560_v0 = vpop.f32.mrb[4].mxu0 }
 0x2e4   : > { %v612_v1 = vadd.f32 %v560_v0, %v513_v61  ;;  %v841_v2 = vpop.f32.mrb[5].mxu0 }
 0x2e5   : > { %v563_v3 = vpop.f32.mrb[6].mxu0 }
 0x2e6   : > { %614 = vst.msk [vmem:[#allocation4] sm:$0xff] %vm354_vm0, %v612_v1  ;;  %v842_v5 = vpop.f32.mrb[7].mxu0 }
 0x2e7   : > { %v606_v6 = vpop.f32.mrb[4].mxu1 }
 0x2e8   : > { %v613_v7 = vadd.f32 %v606_v6, %v514_v4  ;;  %v847_v8 = vpop.f32.mrb[5].mxu1 }
 0x2e9   : > { %v609_v9 = vpop.f32.mrb[6].mxu1 }
 0x2ea   : > { %615 = vst.msk [vmem:[#allocation4 + $0x8] sm:$0xff] %vm354_vm0, %v613_v7  ;;  %v848_v10 = vpop.f32.mrb[7].mxu1 }
 0x2ed   : > { %v621_v12 = vld [vmem:[#allocation4] sm:$0xff] }
 0x2f1   : > { %v622_v15 = vld [vmem:[#allocation4 + $0x8] sm:$0xff] }
 0x331   : > { %v630_v11 = vpop.permute.xlu0 %629 }
 0x332   : > { %v637_v13 = vmul.f32 %v630_v11, %v621_v12 }
 0x334   : > { %v639_v14 = vpack.c.bf16 %v637_v13, %v637_v13 }
 0x335   : > { %v635_v16 = vpop.permute.xlu0 %634 }
 0x336   : > { %642 = vst.msk [vmem:[%s342_s30] sm:$0xf] %vm641_vm4, %v639_v14  ;;  %v638_v17 = vmul.f32 %v635_v16, %v622_v15 }
 0x338   : > { %v640_v18 = vpack.c.bf16 %v638_v17, %v638_v17 }
 0x33a   : > { %643 = vst.msk [vmem:[%s342_s30 + $0x4] sm:$0xf] %vm641_vm4, %v640_v18 }
 0x33b PF: > { %s13_s14 = sadd.s32 1, %s913_s14   ;;  %s1020_s12 = smov %s909_s13 }
 0x33c   : > { %p10_p5 = scmp.ge.s32.totalorder %s13_s14, 4   ;;  %s1021_s13 = smov %s1023_s15 }
 0x33e   :  { %12 = sbr.rel (!%p10_p5) target bundleno = 2 (0x2), region = 76 }

</bundles_post_ra>
